<compile_context>
chip_gen: v6e
topology: v6e:2x2x1
jax: 0.10.0
libtpu: 0.0.40
codegen_flags: <defaults>
</compile_context>

<pallas_src>
import math

import jax
import jax.numpy as jnp
from jax import lax
from jax.experimental import pallas as pl
from jax.experimental.pallas import tpu as pltpu

# ----------------------------- configuration --------------------------------
IMG = 16          # img_size
PATCH = 8         # patch_size
IN_CHANS = 3
EMBED = 32        # embed_dim
DEPTH = 3         # number of (shared-weight) layers
HEADS = 4
MLP_RATIO = 4.0
NUM_CLASSES = 10

HEAD_DIM = EMBED // HEADS
MLP_HID = int(EMBED * MLP_RATIO)
GRID_P = IMG // PATCH
NUM_PATCHES = GRID_P * GRID_P
N_TOK = NUM_PATCHES + 1          # +1 cls token
KDIM = IN_CHANS * PATCH * PATCH
SCALE = HEAD_DIM ** (-0.5)
EPS = 1e-5                       # PyTorch LayerNorm default
HEAD_PAD = 128                   # lane-pad the classifier output


# ------------------------------ kernel helpers -------------------------------
def _layernorm(x, w, b):
    mu = jnp.mean(x, axis=-1, keepdims=True)
    xc = x - mu
    var = jnp.mean(xc * xc, axis=-1, keepdims=True)
    return xc * lax.rsqrt(var + EPS) * w + b


def _gelu_exact(x):
    # exact (erf-based) GELU, matching torch.nn.GELU default
    return 0.5 * x * (1.0 + lax.erf(x * (1.0 / math.sqrt(2.0))))


def _matTdot(a, w):
    # a @ w.T  (2-D): contract last dims of both operands (torch Linear layout)
    return lax.dot_general(a, w, (((1,), (1,)), ((), ())),
                           preferred_element_type=jnp.float32)


# ------------------------------ fused kernel ---------------------------------
def vit_kernel(patches_ref,      # (1, N_TOK, KDIM)   row 0 = zeros (cls slot)
               patch_w_ref,      # (EMBED, KDIM)
               add_ref,          # (N_TOK, EMBED) = cls/patch_b + pos_embed
               qkvw_ref,         # (DEPTH, 3*EMBED, EMBED)   fused QKV weight
               projw_ref,        # (DEPTH, EMBED, EMBED)     proj weight (out,in)
               fc1w_ref,         # (DEPTH, MLP_HID, EMBED)
               fc2w_ref,         # (DEPTH, EMBED, MLP_HID)
               vecs_ref,         # (DEPTH, 8, EMBED)  ln1w,ln1b,ln2w,ln2b,projb,fc2b
               fc1b_ref,         # (DEPTH, 1, MLP_HID)
               fin_ref,          # (8, HEAD_PAD)  row0 norm_w, row1 norm_b, row2 head_b
               head_w_ref,       # (HEAD_PAD, EMBED) zero-padded rows
               out_ref):         # (1, 1, HEAD_PAD)

    # ---- patch embed: conv(kernel=stride=PATCH) == per-patch linear proj ----
    # cls row of `patches` is zero, so x = proj + (cls_token / patch_bias + pos)
    x = _matTdot(patches_ref[0], patch_w_ref[...]) + add_ref[...]   # (N_TOK, C)

    # ---- DEPTH transformer layers, weights resident in VMEM ------------------
    # TODO(synk): at real ViT depths switch this unrolled loop to a layer grid
    # axis / emit_pipeline so per-layer weights stream (v7x 64 MiB VMEM).
    for l in range(DEPTH):
        vl = vecs_ref[l]                              # (8, EMBED)
        ln1w, ln1b = vl[0:1], vl[1:2]
        ln2w, ln2b = vl[2:3], vl[3:4]
        projb, fc2b = vl[4:5], vl[5:6]
        fc1b = fc1b_ref[l]                            # (1, MLP_HID)

        # ----- attention: one fused QKV matmul, batched-head score/AV -----
        h = _layernorm(x, ln1w, ln1b)                                 # (N, C)
        qkv = _matTdot(h, qkvw_ref[l])                                # (N, 3C)

        def head_split(base):
            # static lane slices -> stack along a new leading (head) batch dim
            return jnp.stack(
                [qkv[:, base + hh * HEAD_DIM: base + (hh + 1) * HEAD_DIM]
                 for hh in range(HEADS)], axis=0)                     # (H, N, D)

        q = head_split(0) * SCALE
        k = head_split(EMBED)
        v = head_split(2 * EMBED)

        s = jnp.einsum('hnd,hmd->hnm', q, k,
                       preferred_element_type=jnp.float32)            # (H, N, N)
        s = s - jnp.max(s, axis=-1, keepdims=True)
        e = jnp.exp(s)
        attn = e * pl.reciprocal(jnp.sum(e, axis=-1, keepdims=True), approx=True)
        o = jnp.einsum('hnm,hmd->hnd', attn, v,
                       preferred_element_type=jnp.float32)            # (H, N, D)

        # output projection: concat heads on the lane axis, ONE (C x C) matmul
        o2d = jnp.concatenate([o[hh] for hh in range(HEADS)], axis=-1)  # (N, C)
        x = x + _matTdot(o2d, projw_ref[l]) + projb   # residual (drop_path = Id)

        # ----- MLP -----
        h2 = _layernorm(x, ln2w, ln2b)
        f1 = _matTdot(h2, fc1w_ref[l]) + fc1b                          # (N, HID)
        x = x + _matTdot(_gelu_exact(f1), fc2w_ref[l]) + fc2b          # (N, C)

    # ---- final norm + classifier head on the cls row only --------------------
    fin = fin_ref[...]
    y = _layernorm(x[0:1, :], fin[0:1, :EMBED], fin[1:2, :EMBED])      # (1, C)
    logits = _matTdot(y, head_w_ref[...]) + fin[2:3, :]                # (1, 128)
    out_ref[...] = logits.reshape(1, 1, HEAD_PAD)


# ------------------------------ forward wrapper ------------------------------
@jax.jit
def vit_forward(x, p):
    B = x.shape[0]

    # --- im2col with an inserted zero row per image for the cls-token slot ---
    pt = x.reshape(B, IN_CHANS, GRID_P, PATCH, GRID_P, PATCH)
    pt = pt.transpose(0, 2, 4, 1, 3, 5).reshape(B, NUM_PATCHES, KDIM)
    patches = jnp.concatenate([jnp.zeros((B, 1, KDIM), pt.dtype), pt], axis=1)

    patch_w = p['patch_w'].reshape(EMBED, KDIM)

    # additive term per token (batch-independent): cls+pos[0] / patch_b+pos[1:]
    add_row = jnp.concatenate([p['cls'][0] + p['pos'][0, 0:1],
                               p['patch_b'][None, :] + p['pos'][0, 1:]], axis=0)

    # --- TLEG linear expansion, all layers at once: W_l = A + (l/DEPTH)*B ---
    ils = jnp.arange(DEPTH, dtype=jnp.float32) / DEPTH       # _ilayer
    def le(a, b):
        A, Bm = p[a], p[b]
        return A[None] + ils.reshape((DEPTH,) + (1,) * A.ndim) * Bm[None]

    qkvw = le('qkv_wA', 'qkv_wB')                            # (L, 3C, C)
    projw = le('proj_wA', 'proj_wB')                         # (L, C, C)
    fc1w = le('fc1_wA', 'fc1_wB')                            # (L, HID, C)
    fc2w = le('fc2_wA', 'fc2_wB')                            # (L, C, HID)

    # per-layer EMBED-width vectors packed into one (L, 8, EMBED) buffer
    vecs = jnp.stack([le('ln1_wA', 'ln1_wB'), le('ln1_bA', 'ln1_bB'),
                      le('ln2_wA', 'ln2_wB'), le('ln2_bA', 'ln2_bB'),
                      le('proj_bA', 'proj_bB'), le('fc2_bA', 'fc2_bB'),
                      jnp.zeros((DEPTH, EMBED), jnp.float32),
                      jnp.zeros((DEPTH, EMBED), jnp.float32)], axis=1)
    fc1b = le('fc1_bA', 'fc1_bB').reshape(DEPTH, 1, MLP_HID)

    # final norm weight/bias + head bias folded into one (8, 128) buffer
    fin = jnp.zeros((8, HEAD_PAD), jnp.float32)
    fin = fin.at[0, :EMBED].set(p['norm_w'])
    fin = fin.at[1, :EMBED].set(p['norm_b'])
    fin = fin.at[2, :NUM_CLASSES].set(p['head_b'])
    head_w = jnp.pad(p['head_w'], ((0, HEAD_PAD - NUM_CLASSES), (0, 0)))

    def wspec(shape):
        # full-block, constant index_map -> weight stays resident in VMEM
        return pl.BlockSpec(shape, lambda b, _s=shape: (0,) * len(_s))

    out = pl.pallas_call(
        vit_kernel,
        out_shape=jax.ShapeDtypeStruct((B, 1, HEAD_PAD), jnp.float32),
        grid=(B,),
        in_specs=[
            pl.BlockSpec((1, N_TOK, KDIM), lambda b: (b, 0, 0)),   # patches
            wspec((EMBED, KDIM)),                                  # patch_w
            wspec((N_TOK, EMBED)),                                 # add_row
            wspec((DEPTH, 3 * EMBED, EMBED)),                      # qkvw
            wspec((DEPTH, EMBED, EMBED)),                          # projw
            wspec((DEPTH, MLP_HID, EMBED)),                        # fc1w
            wspec((DEPTH, EMBED, MLP_HID)),                        # fc2w
            wspec((DEPTH, 8, EMBED)),                              # vecs
            wspec((DEPTH, 1, MLP_HID)),                            # fc1b
            wspec((8, HEAD_PAD)),                                  # fin
            wspec((HEAD_PAD, EMBED)),                              # head_w
        ],
        out_specs=pl.BlockSpec((1, 1, HEAD_PAD), lambda b: (b, 0, 0)),
        compiler_params=pltpu.CompilerParams(
            dimension_semantics=("parallel",)),                    # v7x megacore
    )(patches, patch_w, add_row, qkvw, projw, fc1w, fc2w, vecs, fc1b, fin, head_w)

    # strip the lane padding
    return out.reshape(B, HEAD_PAD)[:, :NUM_CLASSES]


# ------------------------------- parameters ----------------------------------
def init_params(key):
    keys = iter(jax.random.split(key, 64))
    nrm = lambda shape, std=0.02: std * jax.random.normal(next(keys), shape,
                                                          jnp.float32)
    p = {}
    # patch embed (Conv2d kernel==stride==PATCH)
    p['patch_w'] = nrm((EMBED, IN_CHANS, PATCH, PATCH))
    p['patch_b'] = nrm((EMBED,))
    p['cls'] = nrm((1, 1, EMBED))
    p['pos'] = nrm((1, N_TOK, EMBED))
    # LE (linear-expansion) parameter pairs: W_l = A + (l/DEPTH) * B
    p['ln1_wA'] = jnp.ones((EMBED,));  p['ln1_wB'] = nrm((EMBED,))
    p['ln1_bA'] = jnp.zeros((EMBED,)); p['ln1_bB'] = nrm((EMBED,))
    p['ln2_wA'] = jnp.ones((EMBED,));  p['ln2_wB'] = nrm((EMBED,))
    p['ln2_bA'] = jnp.zeros((EMBED,)); p['ln2_bB'] = nrm((EMBED,))
    p['qkv_wA'] = nrm((3 * EMBED, EMBED)); p['qkv_wB'] = nrm((3 * EMBED, EMBED))
    p['proj_wA'] = nrm((EMBED, EMBED));    p['proj_wB'] = nrm((EMBED, EMBED))
    p['proj_bA'] = jnp.zeros((EMBED,));    p['proj_bB'] = nrm((EMBED,))
    p['fc1_wA'] = nrm((MLP_HID, EMBED));   p['fc1_wB'] = nrm((MLP_HID, EMBED))
    p['fc1_bA'] = jnp.zeros((MLP_HID,));   p['fc1_bB'] = nrm((MLP_HID,))
    p['fc2_wA'] = nrm((EMBED, MLP_HID));   p['fc2_wB'] = nrm((EMBED, MLP_HID))
    p['fc2_bA'] = jnp.zeros((EMBED,));     p['fc2_bB'] = nrm((EMBED,))
    # final (non-LE) norm + head
    p['norm_w'] = jnp.ones((EMBED,)); p['norm_b'] = jnp.zeros((EMBED,))
    p['head_w'] = nrm((NUM_CLASSES, EMBED)); p['head_b'] = jnp.zeros((NUM_CLASSES,))
    return p


if __name__ == "__main__":
    key = jax.random.PRNGKey(0)
    pkey, xkey = jax.random.split(key)
    params = init_params(pkey)
    x = jax.random.normal(xkey, (2, IN_CHANS, IMG, IMG), jnp.float32)  # NCHW
    out = vit_forward(x, params)
    out = jax.block_until_ready(out)
    assert out.shape == (2, NUM_CLASSES) and out.dtype == jnp.float32
    print("KERNEL_OK")
</pallas_src>

<mosaic_0001>
module attributes {stable_mosaic.version = 11 : i64} {
  func.func @vit_kernel(%arg0: i32, %arg1: memref<1x5x192xf32, #tpu.memory_space<vmem>>, %arg2: memref<32x192xf32, #tpu.memory_space<vmem>>, %arg3: memref<5x32xf32, #tpu.memory_space<vmem>>, %arg4: memref<3x96x32xf32, #tpu.memory_space<vmem>>, %arg5: memref<3x32x32xf32, #tpu.memory_space<vmem>>, %arg6: memref<3x128x32xf32, #tpu.memory_space<vmem>>, %arg7: memref<3x32x128xf32, #tpu.memory_space<vmem>>, %arg8: memref<3x8x32xf32, #tpu.memory_space<vmem>>, %arg9: memref<3x1x128xf32, #tpu.memory_space<vmem>>, %arg10: memref<8x128xf32, #tpu.memory_space<vmem>>, %arg11: memref<128x32xf32, #tpu.memory_space<vmem>>, %arg12: memref<1x1x128xf32, #tpu.memory_space<vmem>>) attributes {dimension_semantics = [#tpu.dimension_semantics<parallel>], iteration_bounds = array<i64: 2>, scalar_prefetch = 0 : i64, scratch_operands = 0 : i64, tpu.core_type = #tpu.core_type<tc>, window_params = [{transform_indices = @transform_0, window_bounds = array<i64: 1, 5, 192>}, {pipeline_mode = #tpu.pipeline_mode<synchronous>, transform_indices = @transform_1, window_bounds = array<i64: 32, 192>}, {pipeline_mode = #tpu.pipeline_mode<synchronous>, transform_indices = @transform_2, window_bounds = array<i64: 5, 32>}, {pipeline_mode = #tpu.pipeline_mode<synchronous>, transform_indices = @transform_3, window_bounds = array<i64: 3, 96, 32>}, {pipeline_mode = #tpu.pipeline_mode<synchronous>, transform_indices = @transform_4, window_bounds = array<i64: 3, 32, 32>}, {pipeline_mode = #tpu.pipeline_mode<synchronous>, transform_indices = @transform_5, window_bounds = array<i64: 3, 128, 32>}, {pipeline_mode = #tpu.pipeline_mode<synchronous>, transform_indices = @transform_6, window_bounds = array<i64: 3, 32, 128>}, {pipeline_mode = #tpu.pipeline_mode<synchronous>, transform_indices = @transform_7, window_bounds = array<i64: 3, 8, 32>}, {pipeline_mode = #tpu.pipeline_mode<synchronous>, transform_indices = @transform_8, window_bounds = array<i64: 3, 1, 128>}, {pipeline_mode = #tpu.pipeline_mode<synchronous>, transform_indices = @transform_9, window_bounds = array<i64: 8, 128>}, {pipeline_mode = #tpu.pipeline_mode<synchronous>, transform_indices = @transform_10, window_bounds = array<i64: 128, 32>}, {transform_indices = @transform_11, window_bounds = array<i64: 1, 1, 128>}]} {
    %c0 = arith.constant 0 : index
    %c0_0 = arith.constant 0 : index
    %c0_1 = arith.constant 0 : index
    %0 = vector.load %arg1[%c0, %c0_0, %c0_1] : memref<1x5x192xf32, #tpu.memory_space<vmem>>, vector<1x5x192xf32>
    %1 = vector.shape_cast %0 : vector<1x5x192xf32> to vector<5x192xf32>
    %c0_2 = arith.constant 0 : index
    %c0_3 = arith.constant 0 : index
    %2 = vector.load %arg2[%c0_2, %c0_3] : memref<32x192xf32, #tpu.memory_space<vmem>>, vector<32x192xf32>
    %cst = arith.constant dense<0.000000e+00> : vector<5x32xf32>
    %3 = tpu.matmul %1, %2, %cst {dimension_numbers = #tpu.dot_dimension_numbers<[1], [1], [0], [0], [0, 0, 1, 0], [], []>} : vector<5x192xf32>, vector<32x192xf32>, vector<5x32xf32> -> vector<5x32xf32>
    %c0_4 = arith.constant 0 : index
    %c0_5 = arith.constant 0 : index
    %4 = vector.load %arg3[%c0_4, %c0_5] : memref<5x32xf32, #tpu.memory_space<vmem>>, vector<5x32xf32>
    %5 = arith.addf %3, %4 : vector<5x32xf32>
    %c0_6 = arith.constant 0 : index
    %c0_7 = arith.constant 0 : index
    %c0_8 = arith.constant 0 : index
    %6 = vector.load %arg8[%c0_6, %c0_7, %c0_8] : memref<3x8x32xf32, #tpu.memory_space<vmem>>, vector<1x8x32xf32>
    %7 = vector.shape_cast %6 : vector<1x8x32xf32> to vector<8x32xf32>
    %8 = vector.extract_strided_slice %7 {offsets = [0, 0], sizes = [1, 32], strides = [1, 1]} : vector<8x32xf32> to vector<1x32xf32>
    %9 = vector.extract_strided_slice %7 {offsets = [1, 0], sizes = [1, 32], strides = [1, 1]} : vector<8x32xf32> to vector<1x32xf32>
    %10 = vector.extract_strided_slice %7 {offsets = [2, 0], sizes = [1, 32], strides = [1, 1]} : vector<8x32xf32> to vector<1x32xf32>
    %11 = vector.extract_strided_slice %7 {offsets = [3, 0], sizes = [1, 32], strides = [1, 1]} : vector<8x32xf32> to vector<1x32xf32>
    %12 = vector.extract_strided_slice %7 {offsets = [4, 0], sizes = [1, 32], strides = [1, 1]} : vector<8x32xf32> to vector<1x32xf32>
    %13 = vector.extract_strided_slice %7 {offsets = [5, 0], sizes = [1, 32], strides = [1, 1]} : vector<8x32xf32> to vector<1x32xf32>
    %c0_9 = arith.constant 0 : index
    %c0_10 = arith.constant 0 : index
    %c0_11 = arith.constant 0 : index
    %14 = vector.load %arg9[%c0_9, %c0_10, %c0_11] : memref<3x1x128xf32, #tpu.memory_space<vmem>>, vector<1x1x128xf32>
    %15 = vector.shape_cast %14 : vector<1x1x128xf32> to vector<1x128xf32>
    %cst_12 = arith.constant dense<0.000000e+00> : vector<5xf32>
    %16 = vector.multi_reduction <add>, %5, %cst_12 [1] : vector<5x32xf32> to vector<5xf32>
    %17 = vector.shape_cast %16 : vector<5xf32> to vector<5x1xf32>
    %cst_13 = arith.constant 3.200000e+01 : f32
    %18 = vector.broadcast %cst_13 : f32 to vector<5x1xf32>
    %19 = arith.divf %17, %18 : vector<5x1xf32>
    %20 = vector.broadcast %19 : vector<5x1xf32> to vector<5x32xf32>
    %21 = arith.subf %5, %20 : vector<5x32xf32>
    %22 = arith.mulf %21, %21 : vector<5x32xf32>
    %cst_14 = arith.constant dense<0.000000e+00> : vector<5xf32>
    %23 = vector.multi_reduction <add>, %22, %cst_14 [1] : vector<5x32xf32> to vector<5xf32>
    %24 = vector.shape_cast %23 : vector<5xf32> to vector<5x1xf32>
    %cst_15 = arith.constant 3.200000e+01 : f32
    %25 = vector.broadcast %cst_15 : f32 to vector<5x1xf32>
    %26 = arith.divf %24, %25 : vector<5x1xf32>
    %cst_16 = arith.constant 9.99999974E-6 : f32
    %27 = vector.broadcast %cst_16 : f32 to vector<5x1xf32>
    %28 = arith.addf %26, %27 : vector<5x1xf32>
    %29 = math.rsqrt %28 : vector<5x1xf32>
    %30 = vector.broadcast %29 : vector<5x1xf32> to vector<5x32xf32>
    %31 = arith.mulf %21, %30 : vector<5x32xf32>
    %32 = vector.broadcast %8 : vector<1x32xf32> to vector<5x32xf32>
    %33 = arith.mulf %31, %32 : vector<5x32xf32>
    %34 = vector.broadcast %9 : vector<1x32xf32> to vector<5x32xf32>
    %35 = arith.addf %33, %34 : vector<5x32xf32>
    %c0_17 = arith.constant 0 : index
    %c0_18 = arith.constant 0 : index
    %c0_19 = arith.constant 0 : index
    %36 = vector.load %arg4[%c0_17, %c0_18, %c0_19] : memref<3x96x32xf32, #tpu.memory_space<vmem>>, vector<1x96x32xf32>
    %37 = vector.shape_cast %36 : vector<1x96x32xf32> to vector<96x32xf32>
    %cst_20 = arith.constant dense<0.000000e+00> : vector<5x96xf32>
    %38 = tpu.matmul %35, %37, %cst_20 {dimension_numbers = #tpu.dot_dimension_numbers<[1], [1], [0], [0], [0, 0, 1, 0], [], []>} : vector<5x32xf32>, vector<96x32xf32>, vector<5x96xf32> -> vector<5x96xf32>
    %39 = vector.extract_strided_slice %38 {offsets = [0, 0], sizes = [5, 8], strides = [1, 1]} : vector<5x96xf32> to vector<5x8xf32>
    %40 = vector.extract_strided_slice %38 {offsets = [0, 8], sizes = [5, 8], strides = [1, 1]} : vector<5x96xf32> to vector<5x8xf32>
    %41 = vector.extract_strided_slice %38 {offsets = [0, 16], sizes = [5, 8], strides = [1, 1]} : vector<5x96xf32> to vector<5x8xf32>
    %42 = vector.extract_strided_slice %38 {offsets = [0, 24], sizes = [5, 8], strides = [1, 1]} : vector<5x96xf32> to vector<5x8xf32>
    %43 = vector.shape_cast %39 : vector<5x8xf32> to vector<1x5x8xf32>
    %44 = vector.shape_cast %40 : vector<5x8xf32> to vector<1x5x8xf32>
    %45 = vector.shape_cast %41 : vector<5x8xf32> to vector<1x5x8xf32>
    %46 = vector.shape_cast %42 : vector<5x8xf32> to vector<1x5x8xf32>
    %47 = tpu.concatenate %43, %44, %45, %46 in 0 : vector<1x5x8xf32>, vector<1x5x8xf32>, vector<1x5x8xf32>, vector<1x5x8xf32> -> vector<4x5x8xf32>
    %cst_21 = arith.constant 0.353553385 : f32
    %48 = vector.broadcast %cst_21 : f32 to vector<4x5x8xf32>
    %49 = arith.mulf %47, %48 : vector<4x5x8xf32>
    %50 = vector.extract_strided_slice %38 {offsets = [0, 32], sizes = [5, 8], strides = [1, 1]} : vector<5x96xf32> to vector<5x8xf32>
    %51 = vector.extract_strided_slice %38 {offsets = [0, 40], sizes = [5, 8], strides = [1, 1]} : vector<5x96xf32> to vector<5x8xf32>
    %52 = vector.extract_strided_slice %38 {offsets = [0, 48], sizes = [5, 8], strides = [1, 1]} : vector<5x96xf32> to vector<5x8xf32>
    %53 = vector.extract_strided_slice %38 {offsets = [0, 56], sizes = [5, 8], strides = [1, 1]} : vector<5x96xf32> to vector<5x8xf32>
    %54 = vector.shape_cast %50 : vector<5x8xf32> to vector<1x5x8xf32>
    %55 = vector.shape_cast %51 : vector<5x8xf32> to vector<1x5x8xf32>
    %56 = vector.shape_cast %52 : vector<5x8xf32> to vector<1x5x8xf32>
    %57 = vector.shape_cast %53 : vector<5x8xf32> to vector<1x5x8xf32>
    %58 = tpu.concatenate %54, %55, %56, %57 in 0 : vector<1x5x8xf32>, vector<1x5x8xf32>, vector<1x5x8xf32>, vector<1x5x8xf32> -> vector<4x5x8xf32>
    %59 = vector.extract_strided_slice %38 {offsets = [0, 64], sizes = [5, 8], strides = [1, 1]} : vector<5x96xf32> to vector<5x8xf32>
    %60 = vector.extract_strided_slice %38 {offsets = [0, 72], sizes = [5, 8], strides = [1, 1]} : vector<5x96xf32> to vector<5x8xf32>
    %61 = vector.extract_strided_slice %38 {offsets = [0, 80], sizes = [5, 8], strides = [1, 1]} : vector<5x96xf32> to vector<5x8xf32>
    %62 = vector.extract_strided_slice %38 {offsets = [0, 88], sizes = [5, 8], strides = [1, 1]} : vector<5x96xf32> to vector<5x8xf32>
    %63 = vector.shape_cast %59 : vector<5x8xf32> to vector<1x5x8xf32>
    %64 = vector.shape_cast %60 : vector<5x8xf32> to vector<1x5x8xf32>
    %65 = vector.shape_cast %61 : vector<5x8xf32> to vector<1x5x8xf32>
    %66 = vector.shape_cast %62 : vector<5x8xf32> to vector<1x5x8xf32>
    %67 = tpu.concatenate %63, %64, %65, %66 in 0 : vector<1x5x8xf32>, vector<1x5x8xf32>, vector<1x5x8xf32>, vector<1x5x8xf32> -> vector<4x5x8xf32>
    "tpu.trace_start"() <{level = 10 : i32, message = "hnd,hmd->hnm"}> : () -> ()
    %cst_22 = arith.constant dense<0.000000e+00> : vector<4x5x5xf32>
    %68 = tpu.matmul %49, %58, %cst_22 {dimension_numbers = #tpu.dot_dimension_numbers<[2], [2], [1], [1], [0, 0, 0, 1, 1, 1], [0], [0]>} : vector<4x5x8xf32>, vector<4x5x8xf32>, vector<4x5x5xf32> -> vector<4x5x5xf32>
    "tpu.trace_stop"() : () -> ()
    %cst_23 = arith.constant dense<0xFF800000> : vector<4x5xf32>
    %69 = vector.multi_reduction <maximumf>, %68, %cst_23 [2] : vector<4x5x5xf32> to vector<4x5xf32>
    %70 = vector.shape_cast %69 : vector<4x5xf32> to vector<4x5x1xf32>
    %71 = vector.broadcast %70 : vector<4x5x1xf32> to vector<4x5x5xf32>
    %72 = arith.subf %68, %71 : vector<4x5x5xf32>
    %73 = math.exp %72 : vector<4x5x5xf32>
    %cst_24 = arith.constant dense<0.000000e+00> : vector<4x5xf32>
    %74 = vector.multi_reduction <add>, %73, %cst_24 [2] : vector<4x5x5xf32> to vector<4x5xf32>
    %75 = vector.shape_cast %74 : vector<4x5xf32> to vector<4x5x1xf32>
    %76 = tpu.reciprocal %75 {approx = true} : vector<4x5x1xf32> -> vector<4x5x1xf32>
    %77 = vector.broadcast %76 : vector<4x5x1xf32> to vector<4x5x5xf32>
    %78 = arith.mulf %73, %77 : vector<4x5x5xf32>
    "tpu.trace_start"() <{level = 10 : i32, message = "hnm,hmd->hnd"}> : () -> ()
    %cst_25 = arith.constant dense<0.000000e+00> : vector<4x5x8xf32>
    %79 = tpu.matmul %78, %67, %cst_25 {dimension_numbers = #tpu.dot_dimension_numbers<[2], [1], [1], [2], [0, 0, 0, 1, 1, 2], [0], [0]>} : vector<4x5x5xf32>, vector<4x5x8xf32>, vector<4x5x8xf32> -> vector<4x5x8xf32>
    "tpu.trace_stop"() : () -> ()
    %80 = vector.extract_strided_slice %79 {offsets = [0, 0, 0], sizes = [1, 5, 8], strides = [1, 1, 1]} : vector<4x5x8xf32> to vector<1x5x8xf32>
    %81 = vector.shape_cast %80 : vector<1x5x8xf32> to vector<5x8xf32>
    %82 = vector.extract_strided_slice %79 {offsets = [1, 0, 0], sizes = [1, 5, 8], strides = [1, 1, 1]} : vector<4x5x8xf32> to vector<1x5x8xf32>
    %83 = vector.shape_cast %82 : vector<1x5x8xf32> to vector<5x8xf32>
    %84 = vector.extract_strided_slice %79 {offsets = [2, 0, 0], sizes = [1, 5, 8], strides = [1, 1, 1]} : vector<4x5x8xf32> to vector<1x5x8xf32>
    %85 = vector.shape_cast %84 : vector<1x5x8xf32> to vector<5x8xf32>
    %86 = vector.extract_strided_slice %79 {offsets = [3, 0, 0], sizes = [1, 5, 8], strides = [1, 1, 1]} : vector<4x5x8xf32> to vector<1x5x8xf32>
    %87 = vector.shape_cast %86 : vector<1x5x8xf32> to vector<5x8xf32>
    %88 = tpu.concatenate %81, %83, %85, %87 in 1 : vector<5x8xf32>, vector<5x8xf32>, vector<5x8xf32>, vector<5x8xf32> -> vector<5x32xf32>
    %c0_26 = arith.constant 0 : index
    %c0_27 = arith.constant 0 : index
    %c0_28 = arith.constant 0 : index
    %89 = vector.load %arg5[%c0_26, %c0_27, %c0_28] : memref<3x32x32xf32, #tpu.memory_space<vmem>>, vector<1x32x32xf32>
    %90 = vector.shape_cast %89 : vector<1x32x32xf32> to vector<32x32xf32>
    %cst_29 = arith.constant dense<0.000000e+00> : vector<5x32xf32>
    %91 = tpu.matmul %88, %90, %cst_29 {dimension_numbers = #tpu.dot_dimension_numbers<[1], [1], [0], [0], [0, 0, 1, 0], [], []>} : vector<5x32xf32>, vector<32x32xf32>, vector<5x32xf32> -> vector<5x32xf32>
    %92 = arith.addf %5, %91 : vector<5x32xf32>
    %93 = vector.broadcast %12 : vector<1x32xf32> to vector<5x32xf32>
    %94 = arith.addf %92, %93 : vector<5x32xf32>
    %cst_30 = arith.constant dense<0.000000e+00> : vector<5xf32>
    %95 = vector.multi_reduction <add>, %94, %cst_30 [1] : vector<5x32xf32> to vector<5xf32>
    %96 = vector.shape_cast %95 : vector<5xf32> to vector<5x1xf32>
    %cst_31 = arith.constant 3.200000e+01 : f32
    %97 = vector.broadcast %cst_31 : f32 to vector<5x1xf32>
    %98 = arith.divf %96, %97 : vector<5x1xf32>
    %99 = vector.broadcast %98 : vector<5x1xf32> to vector<5x32xf32>
    %100 = arith.subf %94, %99 : vector<5x32xf32>
    %101 = arith.mulf %100, %100 : vector<5x32xf32>
    %cst_32 = arith.constant dense<0.000000e+00> : vector<5xf32>
    %102 = vector.multi_reduction <add>, %101, %cst_32 [1] : vector<5x32xf32> to vector<5xf32>
    %103 = vector.shape_cast %102 : vector<5xf32> to vector<5x1xf32>
    %cst_33 = arith.constant 3.200000e+01 : f32
    %104 = vector.broadcast %cst_33 : f32 to vector<5x1xf32>
    %105 = arith.divf %103, %104 : vector<5x1xf32>
    %cst_34 = arith.constant 9.99999974E-6 : f32
    %106 = vector.broadcast %cst_34 : f32 to vector<5x1xf32>
    %107 = arith.addf %105, %106 : vector<5x1xf32>
    %108 = math.rsqrt %107 : vector<5x1xf32>
    %109 = vector.broadcast %108 : vector<5x1xf32> to vector<5x32xf32>
    %110 = arith.mulf %100, %109 : vector<5x32xf32>
    %111 = vector.broadcast %10 : vector<1x32xf32> to vector<5x32xf32>
    %112 = arith.mulf %110, %111 : vector<5x32xf32>
    %113 = vector.broadcast %11 : vector<1x32xf32> to vector<5x32xf32>
    %114 = arith.addf %112, %113 : vector<5x32xf32>
    %c0_35 = arith.constant 0 : index
    %c0_36 = arith.constant 0 : index
    %c0_37 = arith.constant 0 : index
    %115 = vector.load %arg6[%c0_35, %c0_36, %c0_37] : memref<3x128x32xf32, #tpu.memory_space<vmem>>, vector<1x128x32xf32>
    %116 = vector.shape_cast %115 : vector<1x128x32xf32> to vector<128x32xf32>
    %cst_38 = arith.constant dense<0.000000e+00> : vector<5x128xf32>
    %117 = tpu.matmul %114, %116, %cst_38 {dimension_numbers = #tpu.dot_dimension_numbers<[1], [1], [0], [0], [0, 0, 1, 0], [], []>} : vector<5x32xf32>, vector<128x32xf32>, vector<5x128xf32> -> vector<5x128xf32>
    %118 = vector.broadcast %15 : vector<1x128xf32> to vector<5x128xf32>
    %119 = arith.addf %117, %118 : vector<5x128xf32>
    %cst_39 = arith.constant 5.000000e-01 : f32
    %120 = vector.broadcast %cst_39 : f32 to vector<5x128xf32>
    %121 = arith.mulf %120, %119 : vector<5x128xf32>
    %cst_40 = arith.constant 0.707106769 : f32
    %122 = vector.broadcast %cst_40 : f32 to vector<5x128xf32>
    %123 = arith.mulf %119, %122 : vector<5x128xf32>
    %124 = math.erf %123 : vector<5x128xf32>
    %cst_41 = arith.constant 1.000000e+00 : f32
    %125 = vector.broadcast %cst_41 : f32 to vector<5x128xf32>
    %126 = arith.addf %125, %124 : vector<5x128xf32>
    %127 = arith.mulf %121, %126 : vector<5x128xf32>
    %c0_42 = arith.constant 0 : index
    %c0_43 = arith.constant 0 : index
    %c0_44 = arith.constant 0 : index
    %128 = vector.load %arg7[%c0_42, %c0_43, %c0_44] : memref<3x32x128xf32, #tpu.memory_space<vmem>>, vector<1x32x128xf32>
    %129 = vector.shape_cast %128 : vector<1x32x128xf32> to vector<32x128xf32>
    %cst_45 = arith.constant dense<0.000000e+00> : vector<5x32xf32>
    %130 = tpu.matmul %127, %129, %cst_45 {dimension_numbers = #tpu.dot_dimension_numbers<[1], [1], [0], [0], [0, 0, 1, 0], [], []>} : vector<5x128xf32>, vector<32x128xf32>, vector<5x32xf32> -> vector<5x32xf32>
    %131 = arith.addf %94, %130 : vector<5x32xf32>
    %132 = vector.broadcast %13 : vector<1x32xf32> to vector<5x32xf32>
    %133 = arith.addf %131, %132 : vector<5x32xf32>
    %c1 = arith.constant 1 : index
    %c0_46 = arith.constant 0 : index
    %c0_47 = arith.constant 0 : index
    %134 = vector.load %arg8[%c1, %c0_46, %c0_47] : memref<3x8x32xf32, #tpu.memory_space<vmem>>, vector<1x8x32xf32>
    %135 = vector.shape_cast %134 : vector<1x8x32xf32> to vector<8x32xf32>
    %136 = vector.extract_strided_slice %135 {offsets = [0, 0], sizes = [1, 32], strides = [1, 1]} : vector<8x32xf32> to vector<1x32xf32>
    %137 = vector.extract_strided_slice %135 {offsets = [1, 0], sizes = [1, 32], strides = [1, 1]} : vector<8x32xf32> to vector<1x32xf32>
    %138 = vector.extract_strided_slice %135 {offsets = [2, 0], sizes = [1, 32], strides = [1, 1]} : vector<8x32xf32> to vector<1x32xf32>
    %139 = vector.extract_strided_slice %135 {offsets = [3, 0], sizes = [1, 32], strides = [1, 1]} : vector<8x32xf32> to vector<1x32xf32>
    %140 = vector.extract_strided_slice %135 {offsets = [4, 0], sizes = [1, 32], strides = [1, 1]} : vector<8x32xf32> to vector<1x32xf32>
    %141 = vector.extract_strided_slice %135 {offsets = [5, 0], sizes = [1, 32], strides = [1, 1]} : vector<8x32xf32> to vector<1x32xf32>
    %c1_48 = arith.constant 1 : index
    %c0_49 = arith.constant 0 : index
    %c0_50 = arith.constant 0 : index
    %142 = vector.load %arg9[%c1_48, %c0_49, %c0_50] : memref<3x1x128xf32, #tpu.memory_space<vmem>>, vector<1x1x128xf32>
    %143 = vector.shape_cast %142 : vector<1x1x128xf32> to vector<1x128xf32>
    %cst_51 = arith.constant dense<0.000000e+00> : vector<5xf32>
    %144 = vector.multi_reduction <add>, %133, %cst_51 [1] : vector<5x32xf32> to vector<5xf32>
    %145 = vector.shape_cast %144 : vector<5xf32> to vector<5x1xf32>
    %cst_52 = arith.constant 3.200000e+01 : f32
    %146 = vector.broadcast %cst_52 : f32 to vector<5x1xf32>
    %147 = arith.divf %145, %146 : vector<5x1xf32>
    %148 = vector.broadcast %147 : vector<5x1xf32> to vector<5x32xf32>
    %149 = arith.subf %133, %148 : vector<5x32xf32>
    %150 = arith.mulf %149, %149 : vector<5x32xf32>
    %cst_53 = arith.constant dense<0.000000e+00> : vector<5xf32>
    %151 = vector.multi_reduction <add>, %150, %cst_53 [1] : vector<5x32xf32> to vector<5xf32>
    %152 = vector.shape_cast %151 : vector<5xf32> to vector<5x1xf32>
    %cst_54 = arith.constant 3.200000e+01 : f32
    %153 = vector.broadcast %cst_54 : f32 to vector<5x1xf32>
    %154 = arith.divf %152, %153 : vector<5x1xf32>
    %cst_55 = arith.constant 9.99999974E-6 : f32
    %155 = vector.broadcast %cst_55 : f32 to vector<5x1xf32>
    %156 = arith.addf %154, %155 : vector<5x1xf32>
    %157 = math.rsqrt %156 : vector<5x1xf32>
    %158 = vector.broadcast %157 : vector<5x1xf32> to vector<5x32xf32>
    %159 = arith.mulf %149, %158 : vector<5x32xf32>
    %160 = vector.broadcast %136 : vector<1x32xf32> to vector<5x32xf32>
    %161 = arith.mulf %159, %160 : vector<5x32xf32>
    %162 = vector.broadcast %137 : vector<1x32xf32> to vector<5x32xf32>
    %163 = arith.addf %161, %162 : vector<5x32xf32>
    %c1_56 = arith.constant 1 : index
    %c0_57 = arith.constant 0 : index
    %c0_58 = arith.constant 0 : index
    %164 = vector.load %arg4[%c1_56, %c0_57, %c0_58] : memref<3x96x32xf32, #tpu.memory_space<vmem>>, vector<1x96x32xf32>
    %165 = vector.shape_cast %164 : vector<1x96x32xf32> to vector<96x32xf32>
    %cst_59 = arith.constant dense<0.000000e+00> : vector<5x96xf32>
    %166 = tpu.matmul %163, %165, %cst_59 {dimension_numbers = #tpu.dot_dimension_numbers<[1], [1], [0], [0], [0, 0, 1, 0], [], []>} : vector<5x32xf32>, vector<96x32xf32>, vector<5x96xf32> -> vector<5x96xf32>
    %167 = vector.extract_strided_slice %166 {offsets = [0, 0], sizes = [5, 8], strides = [1, 1]} : vector<5x96xf32> to vector<5x8xf32>
    %168 = vector.extract_strided_slice %166 {offsets = [0, 8], sizes = [5, 8], strides = [1, 1]} : vector<5x96xf32> to vector<5x8xf32>
    %169 = vector.extract_strided_slice %166 {offsets = [0, 16], sizes = [5, 8], strides = [1, 1]} : vector<5x96xf32> to vector<5x8xf32>
    %170 = vector.extract_strided_slice %166 {offsets = [0, 24], sizes = [5, 8], strides = [1, 1]} : vector<5x96xf32> to vector<5x8xf32>
    %171 = vector.shape_cast %167 : vector<5x8xf32> to vector<1x5x8xf32>
    %172 = vector.shape_cast %168 : vector<5x8xf32> to vector<1x5x8xf32>
    %173 = vector.shape_cast %169 : vector<5x8xf32> to vector<1x5x8xf32>
    %174 = vector.shape_cast %170 : vector<5x8xf32> to vector<1x5x8xf32>
    %175 = tpu.concatenate %171, %172, %173, %174 in 0 : vector<1x5x8xf32>, vector<1x5x8xf32>, vector<1x5x8xf32>, vector<1x5x8xf32> -> vector<4x5x8xf32>
    %cst_60 = arith.constant 0.353553385 : f32
    %176 = vector.broadcast %cst_60 : f32 to vector<4x5x8xf32>
    %177 = arith.mulf %175, %176 : vector<4x5x8xf32>
    %178 = vector.extract_strided_slice %166 {offsets = [0, 32], sizes = [5, 8], strides = [1, 1]} : vector<5x96xf32> to vector<5x8xf32>
    %179 = vector.extract_strided_slice %166 {offsets = [0, 40], sizes = [5, 8], strides = [1, 1]} : vector<5x96xf32> to vector<5x8xf32>
    %180 = vector.extract_strided_slice %166 {offsets = [0, 48], sizes = [5, 8], strides = [1, 1]} : vector<5x96xf32> to vector<5x8xf32>
    %181 = vector.extract_strided_slice %166 {offsets = [0, 56], sizes = [5, 8], strides = [1, 1]} : vector<5x96xf32> to vector<5x8xf32>
    %182 = vector.shape_cast %178 : vector<5x8xf32> to vector<1x5x8xf32>
    %183 = vector.shape_cast %179 : vector<5x8xf32> to vector<1x5x8xf32>
    %184 = vector.shape_cast %180 : vector<5x8xf32> to vector<1x5x8xf32>
    %185 = vector.shape_cast %181 : vector<5x8xf32> to vector<1x5x8xf32>
    %186 = tpu.concatenate %182, %183, %184, %185 in 0 : vector<1x5x8xf32>, vector<1x5x8xf32>, vector<1x5x8xf32>, vector<1x5x8xf32> -> vector<4x5x8xf32>
    %187 = vector.extract_strided_slice %166 {offsets = [0, 64], sizes = [5, 8], strides = [1, 1]} : vector<5x96xf32> to vector<5x8xf32>
    %188 = vector.extract_strided_slice %166 {offsets = [0, 72], sizes = [5, 8], strides = [1, 1]} : vector<5x96xf32> to vector<5x8xf32>
    %189 = vector.extract_strided_slice %166 {offsets = [0, 80], sizes = [5, 8], strides = [1, 1]} : vector<5x96xf32> to vector<5x8xf32>
    %190 = vector.extract_strided_slice %166 {offsets = [0, 88], sizes = [5, 8], strides = [1, 1]} : vector<5x96xf32> to vector<5x8xf32>
    %191 = vector.shape_cast %187 : vector<5x8xf32> to vector<1x5x8xf32>
    %192 = vector.shape_cast %188 : vector<5x8xf32> to vector<1x5x8xf32>
    %193 = vector.shape_cast %189 : vector<5x8xf32> to vector<1x5x8xf32>
    %194 = vector.shape_cast %190 : vector<5x8xf32> to vector<1x5x8xf32>
    %195 = tpu.concatenate %191, %192, %193, %194 in 0 : vector<1x5x8xf32>, vector<1x5x8xf32>, vector<1x5x8xf32>, vector<1x5x8xf32> -> vector<4x5x8xf32>
    "tpu.trace_start"() <{level = 10 : i32, message = "hnd,hmd->hnm"}> : () -> ()
    %cst_61 = arith.constant dense<0.000000e+00> : vector<4x5x5xf32>
    %196 = tpu.matmul %177, %186, %cst_61 {dimension_numbers = #tpu.dot_dimension_numbers<[2], [2], [1], [1], [0, 0, 0, 1, 1, 1], [0], [0]>} : vector<4x5x8xf32>, vector<4x5x8xf32>, vector<4x5x5xf32> -> vector<4x5x5xf32>
    "tpu.trace_stop"() : () -> ()
    %cst_62 = arith.constant dense<0xFF800000> : vector<4x5xf32>
    %197 = vector.multi_reduction <maximumf>, %196, %cst_62 [2] : vector<4x5x5xf32> to vector<4x5xf32>
    %198 = vector.shape_cast %197 : vector<4x5xf32> to vector<4x5x1xf32>
    %199 = vector.broadcast %198 : vector<4x5x1xf32> to vector<4x5x5xf32>
    %200 = arith.subf %196, %199 : vector<4x5x5xf32>
    %201 = math.exp %200 : vector<4x5x5xf32>
    %cst_63 = arith.constant dense<0.000000e+00> : vector<4x5xf32>
    %202 = vector.multi_reduction <add>, %201, %cst_63 [2] : vector<4x5x5xf32> to vector<4x5xf32>
    %203 = vector.shape_cast %202 : vector<4x5xf32> to vector<4x5x1xf32>
    %204 = tpu.reciprocal %203 {approx = true} : vector<4x5x1xf32> -> vector<4x5x1xf32>
    %205 = vector.broadcast %204 : vector<4x5x1xf32> to vector<4x5x5xf32>
    %206 = arith.mulf %201, %205 : vector<4x5x5xf32>
    "tpu.trace_start"() <{level = 10 : i32, message = "hnm,hmd->hnd"}> : () -> ()
    %cst_64 = arith.constant dense<0.000000e+00> : vector<4x5x8xf32>
    %207 = tpu.matmul %206, %195, %cst_64 {dimension_numbers = #tpu.dot_dimension_numbers<[2], [1], [1], [2], [0, 0, 0, 1, 1, 2], [0], [0]>} : vector<4x5x5xf32>, vector<4x5x8xf32>, vector<4x5x8xf32> -> vector<4x5x8xf32>
    "tpu.trace_stop"() : () -> ()
    %208 = vector.extract_strided_slice %207 {offsets = [0, 0, 0], sizes = [1, 5, 8], strides = [1, 1, 1]} : vector<4x5x8xf32> to vector<1x5x8xf32>
    %209 = vector.shape_cast %208 : vector<1x5x8xf32> to vector<5x8xf32>
    %210 = vector.extract_strided_slice %207 {offsets = [1, 0, 0], sizes = [1, 5, 8], strides = [1, 1, 1]} : vector<4x5x8xf32> to vector<1x5x8xf32>
    %211 = vector.shape_cast %210 : vector<1x5x8xf32> to vector<5x8xf32>
    %212 = vector.extract_strided_slice %207 {offsets = [2, 0, 0], sizes = [1, 5, 8], strides = [1, 1, 1]} : vector<4x5x8xf32> to vector<1x5x8xf32>
    %213 = vector.shape_cast %212 : vector<1x5x8xf32> to vector<5x8xf32>
    %214 = vector.extract_strided_slice %207 {offsets = [3, 0, 0], sizes = [1, 5, 8], strides = [1, 1, 1]} : vector<4x5x8xf32> to vector<1x5x8xf32>
    %215 = vector.shape_cast %214 : vector<1x5x8xf32> to vector<5x8xf32>
    %216 = tpu.concatenate %209, %211, %213, %215 in 1 : vector<5x8xf32>, vector<5x8xf32>, vector<5x8xf32>, vector<5x8xf32> -> vector<5x32xf32>
    %c1_65 = arith.constant 1 : index
    %c0_66 = arith.constant 0 : index
    %c0_67 = arith.constant 0 : index
    %217 = vector.load %arg5[%c1_65, %c0_66, %c0_67] : memref<3x32x32xf32, #tpu.memory_space<vmem>>, vector<1x32x32xf32>
    %218 = vector.shape_cast %217 : vector<1x32x32xf32> to vector<32x32xf32>
    %cst_68 = arith.constant dense<0.000000e+00> : vector<5x32xf32>
    %219 = tpu.matmul %216, %218, %cst_68 {dimension_numbers = #tpu.dot_dimension_numbers<[1], [1], [0], [0], [0, 0, 1, 0], [], []>} : vector<5x32xf32>, vector<32x32xf32>, vector<5x32xf32> -> vector<5x32xf32>
    %220 = arith.addf %133, %219 : vector<5x32xf32>
    %221 = vector.broadcast %140 : vector<1x32xf32> to vector<5x32xf32>
    %222 = arith.addf %220, %221 : vector<5x32xf32>
    %cst_69 = arith.constant dense<0.000000e+00> : vector<5xf32>
    %223 = vector.multi_reduction <add>, %222, %cst_69 [1] : vector<5x32xf32> to vector<5xf32>
    %224 = vector.shape_cast %223 : vector<5xf32> to vector<5x1xf32>
    %cst_70 = arith.constant 3.200000e+01 : f32
    %225 = vector.broadcast %cst_70 : f32 to vector<5x1xf32>
    %226 = arith.divf %224, %225 : vector<5x1xf32>
    %227 = vector.broadcast %226 : vector<5x1xf32> to vector<5x32xf32>
    %228 = arith.subf %222, %227 : vector<5x32xf32>
    %229 = arith.mulf %228, %228 : vector<5x32xf32>
    %cst_71 = arith.constant dense<0.000000e+00> : vector<5xf32>
    %230 = vector.multi_reduction <add>, %229, %cst_71 [1] : vector<5x32xf32> to vector<5xf32>
    %231 = vector.shape_cast %230 : vector<5xf32> to vector<5x1xf32>
    %cst_72 = arith.constant 3.200000e+01 : f32
    %232 = vector.broadcast %cst_72 : f32 to vector<5x1xf32>
    %233 = arith.divf %231, %232 : vector<5x1xf32>
    %cst_73 = arith.constant 9.99999974E-6 : f32
    %234 = vector.broadcast %cst_73 : f32 to vector<5x1xf32>
    %235 = arith.addf %233, %234 : vector<5x1xf32>
    %236 = math.rsqrt %235 : vector<5x1xf32>
    %237 = vector.broadcast %236 : vector<5x1xf32> to vector<5x32xf32>
    %238 = arith.mulf %228, %237 : vector<5x32xf32>
    %239 = vector.broadcast %138 : vector<1x32xf32> to vector<5x32xf32>
    %240 = arith.mulf %238, %239 : vector<5x32xf32>
    %241 = vector.broadcast %139 : vector<1x32xf32> to vector<5x32xf32>
    %242 = arith.addf %240, %241 : vector<5x32xf32>
    %c1_74 = arith.constant 1 : index
    %c0_75 = arith.constant 0 : index
    %c0_76 = arith.constant 0 : index
    %243 = vector.load %arg6[%c1_74, %c0_75, %c0_76] : memref<3x128x32xf32, #tpu.memory_space<vmem>>, vector<1x128x32xf32>
    %244 = vector.shape_cast %243 : vector<1x128x32xf32> to vector<128x32xf32>
    %cst_77 = arith.constant dense<0.000000e+00> : vector<5x128xf32>
    %245 = tpu.matmul %242, %244, %cst_77 {dimension_numbers = #tpu.dot_dimension_numbers<[1], [1], [0], [0], [0, 0, 1, 0], [], []>} : vector<5x32xf32>, vector<128x32xf32>, vector<5x128xf32> -> vector<5x128xf32>
    %246 = vector.broadcast %143 : vector<1x128xf32> to vector<5x128xf32>
    %247 = arith.addf %245, %246 : vector<5x128xf32>
    %cst_78 = arith.constant 5.000000e-01 : f32
    %248 = vector.broadcast %cst_78 : f32 to vector<5x128xf32>
    %249 = arith.mulf %248, %247 : vector<5x128xf32>
    %cst_79 = arith.constant 0.707106769 : f32
    %250 = vector.broadcast %cst_79 : f32 to vector<5x128xf32>
    %251 = arith.mulf %247, %250 : vector<5x128xf32>
    %252 = math.erf %251 : vector<5x128xf32>
    %cst_80 = arith.constant 1.000000e+00 : f32
    %253 = vector.broadcast %cst_80 : f32 to vector<5x128xf32>
    %254 = arith.addf %253, %252 : vector<5x128xf32>
    %255 = arith.mulf %249, %254 : vector<5x128xf32>
    %c1_81 = arith.constant 1 : index
    %c0_82 = arith.constant 0 : index
    %c0_83 = arith.constant 0 : index
    %256 = vector.load %arg7[%c1_81, %c0_82, %c0_83] : memref<3x32x128xf32, #tpu.memory_space<vmem>>, vector<1x32x128xf32>
    %257 = vector.shape_cast %256 : vector<1x32x128xf32> to vector<32x128xf32>
    %cst_84 = arith.constant dense<0.000000e+00> : vector<5x32xf32>
    %258 = tpu.matmul %255, %257, %cst_84 {dimension_numbers = #tpu.dot_dimension_numbers<[1], [1], [0], [0], [0, 0, 1, 0], [], []>} : vector<5x128xf32>, vector<32x128xf32>, vector<5x32xf32> -> vector<5x32xf32>
    %259 = arith.addf %222, %258 : vector<5x32xf32>
    %260 = vector.broadcast %141 : vector<1x32xf32> to vector<5x32xf32>
    %261 = arith.addf %259, %260 : vector<5x32xf32>
    %c2 = arith.constant 2 : index
    %c0_85 = arith.constant 0 : index
    %c0_86 = arith.constant 0 : index
    %262 = vector.load %arg8[%c2, %c0_85, %c0_86] : memref<3x8x32xf32, #tpu.memory_space<vmem>>, vector<1x8x32xf32>
    %263 = vector.shape_cast %262 : vector<1x8x32xf32> to vector<8x32xf32>
    %264 = vector.extract_strided_slice %263 {offsets = [0, 0], sizes = [1, 32], strides = [1, 1]} : vector<8x32xf32> to vector<1x32xf32>
    %265 = vector.extract_strided_slice %263 {offsets = [1, 0], sizes = [1, 32], strides = [1, 1]} : vector<8x32xf32> to vector<1x32xf32>
    %266 = vector.extract_strided_slice %263 {offsets = [2, 0], sizes = [1, 32], strides = [1, 1]} : vector<8x32xf32> to vector<1x32xf32>
    %267 = vector.extract_strided_slice %263 {offsets = [3, 0], sizes = [1, 32], strides = [1, 1]} : vector<8x32xf32> to vector<1x32xf32>
    %268 = vector.extract_strided_slice %263 {offsets = [4, 0], sizes = [1, 32], strides = [1, 1]} : vector<8x32xf32> to vector<1x32xf32>
    %269 = vector.extract_strided_slice %263 {offsets = [5, 0], sizes = [1, 32], strides = [1, 1]} : vector<8x32xf32> to vector<1x32xf32>
    %c2_87 = arith.constant 2 : index
    %c0_88 = arith.constant 0 : index
    %c0_89 = arith.constant 0 : index
    %270 = vector.load %arg9[%c2_87, %c0_88, %c0_89] : memref<3x1x128xf32, #tpu.memory_space<vmem>>, vector<1x1x128xf32>
    %271 = vector.shape_cast %270 : vector<1x1x128xf32> to vector<1x128xf32>
    %cst_90 = arith.constant dense<0.000000e+00> : vector<5xf32>
    %272 = vector.multi_reduction <add>, %261, %cst_90 [1] : vector<5x32xf32> to vector<5xf32>
    %273 = vector.shape_cast %272 : vector<5xf32> to vector<5x1xf32>
    %cst_91 = arith.constant 3.200000e+01 : f32
    %274 = vector.broadcast %cst_91 : f32 to vector<5x1xf32>
    %275 = arith.divf %273, %274 : vector<5x1xf32>
    %276 = vector.broadcast %275 : vector<5x1xf32> to vector<5x32xf32>
    %277 = arith.subf %261, %276 : vector<5x32xf32>
    %278 = arith.mulf %277, %277 : vector<5x32xf32>
    %cst_92 = arith.constant dense<0.000000e+00> : vector<5xf32>
    %279 = vector.multi_reduction <add>, %278, %cst_92 [1] : vector<5x32xf32> to vector<5xf32>
    %280 = vector.shape_cast %279 : vector<5xf32> to vector<5x1xf32>
    %cst_93 = arith.constant 3.200000e+01 : f32
    %281 = vector.broadcast %cst_93 : f32 to vector<5x1xf32>
    %282 = arith.divf %280, %281 : vector<5x1xf32>
    %cst_94 = arith.constant 9.99999974E-6 : f32
    %283 = vector.broadcast %cst_94 : f32 to vector<5x1xf32>
    %284 = arith.addf %282, %283 : vector<5x1xf32>
    %285 = math.rsqrt %284 : vector<5x1xf32>
    %286 = vector.broadcast %285 : vector<5x1xf32> to vector<5x32xf32>
    %287 = arith.mulf %277, %286 : vector<5x32xf32>
    %288 = vector.broadcast %264 : vector<1x32xf32> to vector<5x32xf32>
    %289 = arith.mulf %287, %288 : vector<5x32xf32>
    %290 = vector.broadcast %265 : vector<1x32xf32> to vector<5x32xf32>
    %291 = arith.addf %289, %290 : vector<5x32xf32>
    %c2_95 = arith.constant 2 : index
    %c0_96 = arith.constant 0 : index
    %c0_97 = arith.constant 0 : index
    %292 = vector.load %arg4[%c2_95, %c0_96, %c0_97] : memref<3x96x32xf32, #tpu.memory_space<vmem>>, vector<1x96x32xf32>
    %293 = vector.shape_cast %292 : vector<1x96x32xf32> to vector<96x32xf32>
    %cst_98 = arith.constant dense<0.000000e+00> : vector<5x96xf32>
    %294 = tpu.matmul %291, %293, %cst_98 {dimension_numbers = #tpu.dot_dimension_numbers<[1], [1], [0], [0], [0, 0, 1, 0], [], []>} : vector<5x32xf32>, vector<96x32xf32>, vector<5x96xf32> -> vector<5x96xf32>
    %295 = vector.extract_strided_slice %294 {offsets = [0, 0], sizes = [5, 8], strides = [1, 1]} : vector<5x96xf32> to vector<5x8xf32>
    %296 = vector.extract_strided_slice %294 {offsets = [0, 8], sizes = [5, 8], strides = [1, 1]} : vector<5x96xf32> to vector<5x8xf32>
    %297 = vector.extract_strided_slice %294 {offsets = [0, 16], sizes = [5, 8], strides = [1, 1]} : vector<5x96xf32> to vector<5x8xf32>
    %298 = vector.extract_strided_slice %294 {offsets = [0, 24], sizes = [5, 8], strides = [1, 1]} : vector<5x96xf32> to vector<5x8xf32>
    %299 = vector.shape_cast %295 : vector<5x8xf32> to vector<1x5x8xf32>
    %300 = vector.shape_cast %296 : vector<5x8xf32> to vector<1x5x8xf32>
    %301 = vector.shape_cast %297 : vector<5x8xf32> to vector<1x5x8xf32>
    %302 = vector.shape_cast %298 : vector<5x8xf32> to vector<1x5x8xf32>
    %303 = tpu.concatenate %299, %300, %301, %302 in 0 : vector<1x5x8xf32>, vector<1x5x8xf32>, vector<1x5x8xf32>, vector<1x5x8xf32> -> vector<4x5x8xf32>
    %cst_99 = arith.constant 0.353553385 : f32
    %304 = vector.broadcast %cst_99 : f32 to vector<4x5x8xf32>
    %305 = arith.mulf %303, %304 : vector<4x5x8xf32>
    %306 = vector.extract_strided_slice %294 {offsets = [0, 32], sizes = [5, 8], strides = [1, 1]} : vector<5x96xf32> to vector<5x8xf32>
    %307 = vector.extract_strided_slice %294 {offsets = [0, 40], sizes = [5, 8], strides = [1, 1]} : vector<5x96xf32> to vector<5x8xf32>
    %308 = vector.extract_strided_slice %294 {offsets = [0, 48], sizes = [5, 8], strides = [1, 1]} : vector<5x96xf32> to vector<5x8xf32>
    %309 = vector.extract_strided_slice %294 {offsets = [0, 56], sizes = [5, 8], strides = [1, 1]} : vector<5x96xf32> to vector<5x8xf32>
    %310 = vector.shape_cast %306 : vector<5x8xf32> to vector<1x5x8xf32>
    %311 = vector.shape_cast %307 : vector<5x8xf32> to vector<1x5x8xf32>
    %312 = vector.shape_cast %308 : vector<5x8xf32> to vector<1x5x8xf32>
    %313 = vector.shape_cast %309 : vector<5x8xf32> to vector<1x5x8xf32>
    %314 = tpu.concatenate %310, %311, %312, %313 in 0 : vector<1x5x8xf32>, vector<1x5x8xf32>, vector<1x5x8xf32>, vector<1x5x8xf32> -> vector<4x5x8xf32>
    %315 = vector.extract_strided_slice %294 {offsets = [0, 64], sizes = [5, 8], strides = [1, 1]} : vector<5x96xf32> to vector<5x8xf32>
    %316 = vector.extract_strided_slice %294 {offsets = [0, 72], sizes = [5, 8], strides = [1, 1]} : vector<5x96xf32> to vector<5x8xf32>
    %317 = vector.extract_strided_slice %294 {offsets = [0, 80], sizes = [5, 8], strides = [1, 1]} : vector<5x96xf32> to vector<5x8xf32>
    %318 = vector.extract_strided_slice %294 {offsets = [0, 88], sizes = [5, 8], strides = [1, 1]} : vector<5x96xf32> to vector<5x8xf32>
    %319 = vector.shape_cast %315 : vector<5x8xf32> to vector<1x5x8xf32>
    %320 = vector.shape_cast %316 : vector<5x8xf32> to vector<1x5x8xf32>
    %321 = vector.shape_cast %317 : vector<5x8xf32> to vector<1x5x8xf32>
    %322 = vector.shape_cast %318 : vector<5x8xf32> to vector<1x5x8xf32>
    %323 = tpu.concatenate %319, %320, %321, %322 in 0 : vector<1x5x8xf32>, vector<1x5x8xf32>, vector<1x5x8xf32>, vector<1x5x8xf32> -> vector<4x5x8xf32>
    "tpu.trace_start"() <{level = 10 : i32, message = "hnd,hmd->hnm"}> : () -> ()
    %cst_100 = arith.constant dense<0.000000e+00> : vector<4x5x5xf32>
    %324 = tpu.matmul %305, %314, %cst_100 {dimension_numbers = #tpu.dot_dimension_numbers<[2], [2], [1], [1], [0, 0, 0, 1, 1, 1], [0], [0]>} : vector<4x5x8xf32>, vector<4x5x8xf32>, vector<4x5x5xf32> -> vector<4x5x5xf32>
    "tpu.trace_stop"() : () -> ()
    %cst_101 = arith.constant dense<0xFF800000> : vector<4x5xf32>
    %325 = vector.multi_reduction <maximumf>, %324, %cst_101 [2] : vector<4x5x5xf32> to vector<4x5xf32>
    %326 = vector.shape_cast %325 : vector<4x5xf32> to vector<4x5x1xf32>
    %327 = vector.broadcast %326 : vector<4x5x1xf32> to vector<4x5x5xf32>
    %328 = arith.subf %324, %327 : vector<4x5x5xf32>
    %329 = math.exp %328 : vector<4x5x5xf32>
    %cst_102 = arith.constant dense<0.000000e+00> : vector<4x5xf32>
    %330 = vector.multi_reduction <add>, %329, %cst_102 [2] : vector<4x5x5xf32> to vector<4x5xf32>
    %331 = vector.shape_cast %330 : vector<4x5xf32> to vector<4x5x1xf32>
    %332 = tpu.reciprocal %331 {approx = true} : vector<4x5x1xf32> -> vector<4x5x1xf32>
    %333 = vector.broadcast %332 : vector<4x5x1xf32> to vector<4x5x5xf32>
    %334 = arith.mulf %329, %333 : vector<4x5x5xf32>
    "tpu.trace_start"() <{level = 10 : i32, message = "hnm,hmd->hnd"}> : () -> ()
    %cst_103 = arith.constant dense<0.000000e+00> : vector<4x5x8xf32>
    %335 = tpu.matmul %334, %323, %cst_103 {dimension_numbers = #tpu.dot_dimension_numbers<[2], [1], [1], [2], [0, 0, 0, 1, 1, 2], [0], [0]>} : vector<4x5x5xf32>, vector<4x5x8xf32>, vector<4x5x8xf32> -> vector<4x5x8xf32>
    "tpu.trace_stop"() : () -> ()
    %336 = vector.extract_strided_slice %335 {offsets = [0, 0, 0], sizes = [1, 5, 8], strides = [1, 1, 1]} : vector<4x5x8xf32> to vector<1x5x8xf32>
    %337 = vector.shape_cast %336 : vector<1x5x8xf32> to vector<5x8xf32>
    %338 = vector.extract_strided_slice %335 {offsets = [1, 0, 0], sizes = [1, 5, 8], strides = [1, 1, 1]} : vector<4x5x8xf32> to vector<1x5x8xf32>
    %339 = vector.shape_cast %338 : vector<1x5x8xf32> to vector<5x8xf32>
    %340 = vector.extract_strided_slice %335 {offsets = [2, 0, 0], sizes = [1, 5, 8], strides = [1, 1, 1]} : vector<4x5x8xf32> to vector<1x5x8xf32>
    %341 = vector.shape_cast %340 : vector<1x5x8xf32> to vector<5x8xf32>
    %342 = vector.extract_strided_slice %335 {offsets = [3, 0, 0], sizes = [1, 5, 8], strides = [1, 1, 1]} : vector<4x5x8xf32> to vector<1x5x8xf32>
    %343 = vector.shape_cast %342 : vector<1x5x8xf32> to vector<5x8xf32>
    %344 = tpu.concatenate %337, %339, %341, %343 in 1 : vector<5x8xf32>, vector<5x8xf32>, vector<5x8xf32>, vector<5x8xf32> -> vector<5x32xf32>
    %c2_104 = arith.constant 2 : index
    %c0_105 = arith.constant 0 : index
    %c0_106 = arith.constant 0 : index
    %345 = vector.load %arg5[%c2_104, %c0_105, %c0_106] : memref<3x32x32xf32, #tpu.memory_space<vmem>>, vector<1x32x32xf32>
    %346 = vector.shape_cast %345 : vector<1x32x32xf32> to vector<32x32xf32>
    %cst_107 = arith.constant dense<0.000000e+00> : vector<5x32xf32>
    %347 = tpu.matmul %344, %346, %cst_107 {dimension_numbers = #tpu.dot_dimension_numbers<[1], [1], [0], [0], [0, 0, 1, 0], [], []>} : vector<5x32xf32>, vector<32x32xf32>, vector<5x32xf32> -> vector<5x32xf32>
    %348 = arith.addf %261, %347 : vector<5x32xf32>
    %349 = vector.broadcast %268 : vector<1x32xf32> to vector<5x32xf32>
    %350 = arith.addf %348, %349 : vector<5x32xf32>
    %cst_108 = arith.constant dense<0.000000e+00> : vector<5xf32>
    %351 = vector.multi_reduction <add>, %350, %cst_108 [1] : vector<5x32xf32> to vector<5xf32>
    %352 = vector.shape_cast %351 : vector<5xf32> to vector<5x1xf32>
    %cst_109 = arith.constant 3.200000e+01 : f32
    %353 = vector.broadcast %cst_109 : f32 to vector<5x1xf32>
    %354 = arith.divf %352, %353 : vector<5x1xf32>
    %355 = vector.broadcast %354 : vector<5x1xf32> to vector<5x32xf32>
    %356 = arith.subf %350, %355 : vector<5x32xf32>
    %357 = arith.mulf %356, %356 : vector<5x32xf32>
    %cst_110 = arith.constant dense<0.000000e+00> : vector<5xf32>
    %358 = vector.multi_reduction <add>, %357, %cst_110 [1] : vector<5x32xf32> to vector<5xf32>
    %359 = vector.shape_cast %358 : vector<5xf32> to vector<5x1xf32>
    %cst_111 = arith.constant 3.200000e+01 : f32
    %360 = vector.broadcast %cst_111 : f32 to vector<5x1xf32>
    %361 = arith.divf %359, %360 : vector<5x1xf32>
    %cst_112 = arith.constant 9.99999974E-6 : f32
    %362 = vector.broadcast %cst_112 : f32 to vector<5x1xf32>
    %363 = arith.addf %361, %362 : vector<5x1xf32>
    %364 = math.rsqrt %363 : vector<5x1xf32>
    %365 = vector.broadcast %364 : vector<5x1xf32> to vector<5x32xf32>
    %366 = arith.mulf %356, %365 : vector<5x32xf32>
    %367 = vector.broadcast %266 : vector<1x32xf32> to vector<5x32xf32>
    %368 = arith.mulf %366, %367 : vector<5x32xf32>
    %369 = vector.broadcast %267 : vector<1x32xf32> to vector<5x32xf32>
    %370 = arith.addf %368, %369 : vector<5x32xf32>
    %c2_113 = arith.constant 2 : index
    %c0_114 = arith.constant 0 : index
    %c0_115 = arith.constant 0 : index
    %371 = vector.load %arg6[%c2_113, %c0_114, %c0_115] : memref<3x128x32xf32, #tpu.memory_space<vmem>>, vector<1x128x32xf32>
    %372 = vector.shape_cast %371 : vector<1x128x32xf32> to vector<128x32xf32>
    %cst_116 = arith.constant dense<0.000000e+00> : vector<5x128xf32>
    %373 = tpu.matmul %370, %372, %cst_116 {dimension_numbers = #tpu.dot_dimension_numbers<[1], [1], [0], [0], [0, 0, 1, 0], [], []>} : vector<5x32xf32>, vector<128x32xf32>, vector<5x128xf32> -> vector<5x128xf32>
    %374 = vector.broadcast %271 : vector<1x128xf32> to vector<5x128xf32>
    %375 = arith.addf %373, %374 : vector<5x128xf32>
    %cst_117 = arith.constant 5.000000e-01 : f32
    %376 = vector.broadcast %cst_117 : f32 to vector<5x128xf32>
    %377 = arith.mulf %376, %375 : vector<5x128xf32>
    %cst_118 = arith.constant 0.707106769 : f32
    %378 = vector.broadcast %cst_118 : f32 to vector<5x128xf32>
    %379 = arith.mulf %375, %378 : vector<5x128xf32>
    %380 = math.erf %379 : vector<5x128xf32>
    %cst_119 = arith.constant 1.000000e+00 : f32
    %381 = vector.broadcast %cst_119 : f32 to vector<5x128xf32>
    %382 = arith.addf %381, %380 : vector<5x128xf32>
    %383 = arith.mulf %377, %382 : vector<5x128xf32>
    %c2_120 = arith.constant 2 : index
    %c0_121 = arith.constant 0 : index
    %c0_122 = arith.constant 0 : index
    %384 = vector.load %arg7[%c2_120, %c0_121, %c0_122] : memref<3x32x128xf32, #tpu.memory_space<vmem>>, vector<1x32x128xf32>
    %385 = vector.shape_cast %384 : vector<1x32x128xf32> to vector<32x128xf32>
    %cst_123 = arith.constant dense<0.000000e+00> : vector<5x32xf32>
    %386 = tpu.matmul %383, %385, %cst_123 {dimension_numbers = #tpu.dot_dimension_numbers<[1], [1], [0], [0], [0, 0, 1, 0], [], []>} : vector<5x128xf32>, vector<32x128xf32>, vector<5x32xf32> -> vector<5x32xf32>
    %387 = arith.addf %350, %386 : vector<5x32xf32>
    %388 = vector.broadcast %269 : vector<1x32xf32> to vector<5x32xf32>
    %389 = arith.addf %387, %388 : vector<5x32xf32>
    %c0_124 = arith.constant 0 : index
    %c0_125 = arith.constant 0 : index
    %390 = vector.load %arg10[%c0_124, %c0_125] : memref<8x128xf32, #tpu.memory_space<vmem>>, vector<8x128xf32>
    %391 = vector.extract_strided_slice %389 {offsets = [0, 0], sizes = [1, 32], strides = [1, 1]} : vector<5x32xf32> to vector<1x32xf32>
    %392 = vector.extract_strided_slice %390 {offsets = [0, 0], sizes = [1, 32], strides = [1, 1]} : vector<8x128xf32> to vector<1x32xf32>
    %393 = vector.extract_strided_slice %390 {offsets = [1, 0], sizes = [1, 32], strides = [1, 1]} : vector<8x128xf32> to vector<1x32xf32>
    %cst_126 = arith.constant dense<0.000000e+00> : vector<1xf32>
    %394 = vector.multi_reduction <add>, %391, %cst_126 [1] : vector<1x32xf32> to vector<1xf32>
    %395 = vector.shape_cast %394 : vector<1xf32> to vector<1x1xf32>
    %cst_127 = arith.constant 3.200000e+01 : f32
    %396 = vector.broadcast %cst_127 : f32 to vector<1x1xf32>
    %397 = arith.divf %395, %396 : vector<1x1xf32>
    %398 = vector.broadcast %397 : vector<1x1xf32> to vector<1x32xf32>
    %399 = arith.subf %391, %398 : vector<1x32xf32>
    %400 = arith.mulf %399, %399 : vector<1x32xf32>
    %cst_128 = arith.constant dense<0.000000e+00> : vector<1xf32>
    %401 = vector.multi_reduction <add>, %400, %cst_128 [1] : vector<1x32xf32> to vector<1xf32>
    %402 = vector.shape_cast %401 : vector<1xf32> to vector<1x1xf32>
    %cst_129 = arith.constant 3.200000e+01 : f32
    %403 = vector.broadcast %cst_129 : f32 to vector<1x1xf32>
    %404 = arith.divf %402, %403 : vector<1x1xf32>
    %cst_130 = arith.constant 9.99999974E-6 : f32
    %405 = vector.broadcast %cst_130 : f32 to vector<1x1xf32>
    %406 = arith.addf %404, %405 : vector<1x1xf32>
    %407 = math.rsqrt %406 : vector<1x1xf32>
    %408 = vector.broadcast %407 : vector<1x1xf32> to vector<1x32xf32>
    %409 = arith.mulf %399, %408 : vector<1x32xf32>
    %410 = arith.mulf %409, %392 : vector<1x32xf32>
    %411 = arith.addf %410, %393 : vector<1x32xf32>
    %c0_131 = arith.constant 0 : index
    %c0_132 = arith.constant 0 : index
    %412 = vector.load %arg11[%c0_131, %c0_132] : memref<128x32xf32, #tpu.memory_space<vmem>>, vector<128x32xf32>
    %cst_133 = arith.constant dense<0.000000e+00> : vector<1x128xf32>
    %413 = tpu.matmul %411, %412, %cst_133 {dimension_numbers = #tpu.dot_dimension_numbers<[1], [1], [0], [0], [0, 0, 1, 0], [], []>} : vector<1x32xf32>, vector<128x32xf32>, vector<1x128xf32> -> vector<1x128xf32>
    %414 = vector.extract_strided_slice %390 {offsets = [2, 0], sizes = [1, 128], strides = [1, 1]} : vector<8x128xf32> to vector<1x128xf32>
    %415 = arith.addf %413, %414 : vector<1x128xf32>
    %416 = vector.shape_cast %415 : vector<1x128xf32> to vector<1x1x128xf32>
    %c0_134 = arith.constant 0 : index
    %c0_135 = arith.constant 0 : index
    %c0_136 = arith.constant 0 : index
    %417 = vector.load %arg12[%c0_134, %c0_135, %c0_136] : memref<1x1x128xf32, #tpu.memory_space<vmem>>, vector<1x1x128xf32>
    tpu.vector_store %arg12[%c0_134, %c0_135, %c0_136], %416 {strides = array<i32>} : memref<1x1x128xf32, #tpu.memory_space<vmem>>, vector<1x1x128xf32>,
    return
  }
  func.func @transform_0(%arg0: i32) -> (i32, i32, i32) {
    %c0_i32 = arith.constant 0 : i32
    %c0_i32_0 = arith.constant 0 : i32
    %c0_i32_1 = arith.constant 0 : i32
    return %arg0, %c0_i32, %c0_i32_0 : i32, i32, i32
  }
  func.func @transform_1(%arg0: i32) -> (i32, i32) {
    %c0_i32 = arith.constant 0 : i32
    %c0_i32_0 = arith.constant 0 : i32
    %c0_i32_1 = arith.constant 0 : i32
    return %c0_i32, %c0_i32_0 : i32, i32
  }
  func.func @transform_2(%arg0: i32) -> (i32, i32) {
    %c0_i32 = arith.constant 0 : i32
    %c0_i32_0 = arith.constant 0 : i32
    %c0_i32_1 = arith.constant 0 : i32
    return %c0_i32, %c0_i32_0 : i32, i32
  }
  func.func @transform_3(%arg0: i32) -> (i32, i32, i32) {
    %c0_i32 = arith.constant 0 : i32
    %c0_i32_0 = arith.constant 0 : i32
    %c0_i32_1 = arith.constant 0 : i32
    %c0_i32_2 = arith.constant 0 : i32
    return %c0_i32, %c0_i32_0, %c0_i32_1 : i32, i32, i32
  }
  func.func @transform_4(%arg0: i32) -> (i32, i32, i32) {
    %c0_i32 = arith.constant 0 : i32
    %c0_i32_0 = arith.constant 0 : i32
    %c0_i32_1 = arith.constant 0 : i32
    %c0_i32_2 = arith.constant 0 : i32
    return %c0_i32, %c0_i32_0, %c0_i32_1 : i32, i32, i32
  }
  func.func @transform_5(%arg0: i32) -> (i32, i32, i32) {
    %c0_i32 = arith.constant 0 : i32
    %c0_i32_0 = arith.constant 0 : i32
    %c0_i32_1 = arith.constant 0 : i32
    %c0_i32_2 = arith.constant 0 : i32
    return %c0_i32, %c0_i32_0, %c0_i32_1 : i32, i32, i32
  }
  func.func @transform_6(%arg0: i32) -> (i32, i32, i32) {
    %c0_i32 = arith.constant 0 : i32
    %c0_i32_0 = arith.constant 0 : i32
    %c0_i32_1 = arith.constant 0 : i32
    %c0_i32_2 = arith.constant 0 : i32
    return %c0_i32, %c0_i32_0, %c0_i32_1 : i32, i32, i32
  }
  func.func @transform_7(%arg0: i32) -> (i32, i32, i32) {
    %c0_i32 = arith.constant 0 : i32
    %c0_i32_0 = arith.constant 0 : i32
    %c0_i32_1 = arith.constant 0 : i32
    %c0_i32_2 = arith.constant 0 : i32
    return %c0_i32, %c0_i32_0, %c0_i32_1 : i32, i32, i32
  }
  func.func @transform_8(%arg0: i32) -> (i32, i32, i32) {
    %c0_i32 = arith.constant 0 : i32
    %c0_i32_0 = arith.constant 0 : i32
    %c0_i32_1 = arith.constant 0 : i32
    %c0_i32_2 = arith.constant 0 : i32
    return %c0_i32, %c0_i32_0, %c0_i32_1 : i32, i32, i32
  }
  func.func @transform_9(%arg0: i32) -> (i32, i32) {
    %c0_i32 = arith.constant 0 : i32
    %c0_i32_0 = arith.constant 0 : i32
    %c0_i32_1 = arith.constant 0 : i32
    return %c0_i32, %c0_i32_0 : i32, i32
  }
  func.func @transform_10(%arg0: i32) -> (i32, i32) {
    %c0_i32 = arith.constant 0 : i32
    %c0_i32_0 = arith.constant 0 : i32
    %c0_i32_1 = arith.constant 0 : i32
    return %c0_i32, %c0_i32_0 : i32, i32
  }
  func.func @transform_11(%arg0: i32) -> (i32, i32, i32) {
    %c0_i32 = arith.constant 0 : i32
    %c0_i32_0 = arith.constant 0 : i32
    %c0_i32_1 = arith.constant 0 : i32
    return %arg0, %c0_i32, %c0_i32_0 : i32, i32, i32
  }
}

</mosaic_0001>

<bundles_post_ra>
// kernel: vit_forward.1
= control target key start
LH: loop header
LB: loop body
LE: loop exit
PB: predicated region body
PF: predicated region fallthrough
CT: control target
= control target key end

     0   :  { %16 = vsyncpa [#allocation3], 0  ;;  %s6515_s0 = inlined_call_operand.vmem [shape: f32[2,5,192], index: 0, kind: input, shape index: {}]   ;;  %s6516_s1 = inlined_call_operand.vmem [shape: f32[32,192], index: 1, kind: input, shape index: {}]   ;;  %s6517_s2 = inlined_call_operand.vmem [shape: f32[5,32], index: 2, kind: input, shape index: {}]   ;;  %s6518_s3 = inlined_call_operand.vmem [shape: f32[3,96,32], index: 3, kind: input, shape index: {}]   ;;  %s6519_s4 = inlined_call_operand.vmem [shape: f32[3,32,32], index: 4, kind: input, shape index: {}]   ;;  %s6520_s5 = inlined_call_operand.vmem [shape: f32[3,128,32], index: 5, kind: input, shape index: {}]   ;;  %s6521_s6 = inlined_call_operand.vmem [shape: f32[3,32,128], index: 6, kind: input, shape index: {}]   ;;  %s6522_s7 = inlined_call_operand.vmem [shape: f32[3,8,32], index: 7, kind: input, shape index: {}]   ;;  %s6523_s8 = inlined_call_operand.vmem [shape: f32[3,1,128], index: 8, kind: input, shape index: {}]   ;;  %s6524_s9 = inlined_call_operand.vmem [shape: f32[8,128], index: 9, kind: input, shape index: {}]   ;;  %s6525_s10 = inlined_call_operand.vmem [shape: f32[128,32], index: 10, kind: input, shape index: {}]   ;;  %s6526_s11 = inlined_call_operand.hbm [shape: f32[2,1,128], index: 11, kind: output, shape index: {}]  }
   0x1   :  { %18 = vsyncpa [#allocation3 + $0x1], 0  ;;  %s5379_s17 = smov 0   ;;  %s5381_s18 = smov 0  }
   0x2   :  { %s5383_s19 = smov 0   ;;  %s5385_s20 = smov 0  }
   0x3 LB: > { %s5400_s21 = sadd.s32 4294967295, %s5306_s20   ;;  %s4273_s22 = sadd.s32 4294967294, %s5306_s20   ;;  %s5306_s20 = sphi %s5385_s20, %s6555_s20   ;;  %s5302_s19 = sphi %s5383_s19, %s6554_s19   ;;  %s5298_s18 = sphi %s5381_s18, %s6553_s18   ;;  %s5294_s17 = sphi %s5379_s17, %s6552_s17  }
   0x4   : > { %s5404_s23 = sadd.s32 1, %s5306_s20   ;;  %s267_s24 = sadd.s32 1, %s5302_s19 }
   0x5   : > { %s264_s25 = ssub.s32 %s5306_s20, %s5404_s23  ;;  %p277_p0 = scmp.ne.s32.totalorder %s5302_s19, %s5298_s18 }
   0x6   : > { %p265_p1 = scmp.eq.s32.totalorder %s264_s25, 0  ;;  %p278_p2 = scmp.eq.s32.totalorder %s5400_s21, 1 }
   0x7   : > { %p283_p3 = scmp.ne.s32.totalorder %s5298_s18, %s5294_s17  ;;  %p284_p4 = scmp.eq.s32.totalorder %s4273_s22, 1 }
   0x8   : > { %s5415_s26 = scalar_select %p265_p1, %s5302_s19, %s267_s24  }
   0x9   : > { %p5417_p5 = por %p278_p2, %p277_p0  ;;  %p5421_p6 = por %p284_p4, %p283_p3 }
   0xa   : > { %6540 = sst [smem:[#allocation5_spill]] %s5415_s26  ;;  %p4276_p7 = scmp.ge.s32.totalorder %s5306_s20, 1 }
   0xb   : > { %p340_p8 = scmp.lt.s32.totalorder %s5306_s20, 3 }
   0xd   : > { %p341_p9 = pnand %p4276_p7, %p340_p8 }
   0xe   : > { %p379_p10 = scmp.lt.s32.totalorder (!%p341_p9), %s5400_s21, 1  ;;  %s6537_s15 = smov (!%p341_p9), 104  }
   0xf   : > { %344 = sbr.rel (%p341_p9) target bundleno = 8167 (0x1fe7), region = 64  ;;  %s6538_s22 = smov (!%p341_p9), 120  }
  0x10   : > { %s6539_s24 = smov (!%p341_p9), 112   ;;  %s6533_s25 = smov (!%p341_p9), 64  }
  0x11   : > { %s6531_s26 = smov (!%p341_p9), 8   ;;  %s6529_s12 = smov (!%p341_p9), 16  }
  0x12   : > { %s6527_s13 = smov (!%p341_p9), 24   ;;  %s6546_s29 = smov (!%p341_p9), 24  }
  0x14   : > { %v393_v0 = vld [vmem:[%s6516_s1 + $0x38] sm:$0xff]  ;;  %vm395_vm0 = vcmask 523264   ;;  %v392_v1 = vld [vmem:[%s6516_s1 + $0x30] sm:$0xff]  ;;  %v391_v2 = vld [vmem:[%s6516_s1 + $0x28] sm:$0xff]  ;;  %s380_s16 = scalar_select %p379_p10, %s5400_s21, 1  ;;  %vm483_vm1 = vcmask 258048   ;;  %v498_v36 = vlaneseq }
  0x15   : > { %4279 = vmatprep.subr.msk.mxu1 %vm395_vm0, %v393_v0  ;;  %v390_v3 = vld [vmem:[%s6516_s1 + $0x20] sm:$0xff]  ;;  %v389_v4 = vld [vmem:[%s6516_s1 + $0x18] sm:$0xff]  ;;  %v388_v6 = vld [vmem:[%s6516_s1 + $0x10] sm:$0xff]  ;;  %vm520_vm2 = vcmask 261120   ;;  %v5308_v16 = vmov 0.0   ;;  %vm5309_vm3 = vmmov 0  }
  0x16   : > { %436 = vmatpush1.xpose.msra.mxu1 %v392_v1  ;;  %s4536_s30 = sshll.u32 %s380_s16, 4  ;;  %v387_v7 = vld [vmem:[%s6516_s1 + $0x8] sm:$0xff]  ;;  %v386_v8 = vld [vmem:[%s6516_s1] sm:$0xff]  ;;  %v519_v15 = vld [vmem:[%s6518_s3 + $0x58] sm:$0xff]  ;;  %4749 = vmatprep.subr.mxu0 %v5308_v16  ;;  %v5536_v37 = vshrl.u32 %v498_v36, 7  ;;  %s6535_s16 = smov 96  }
  0x17   : > { %4280 = vmatprep.subr.msk.mxu1 %vm395_vm0, %v391_v2  ;;  %s383_s14 = scalar_lea.vmem %s6515_s0, %s4536_s30  ;;  %v394_v10 = vld [vmem:[%s6517_s2] sm:$0x1f]  ;;  %v518_v17 = vld [vmem:[%s6518_s3 + $0x50] sm:$0xff]  ;;  %v517_v18 = vld [vmem:[%s6518_s3 + $0x48] sm:$0xff]  ;;  %4751 = vmatprep.mubr.msk.f32.mxu0 %vm5309_vm3, %v5308_v16  ;;  %vm646_vm4 = vcmask 64512   ;;  %vm953_vm5 = vcmask 36864  }
  0x18   : > { %v385_v5 = vld [vmem:[%s383_s14 + $0x8] sm:$0x1f]  ;;  %v384_v9 = vld [vmem:[%s383_s14] sm:$0x1f]  ;;  %v515_v20 = vld [vmem:[%s6518_s3 + $0x38] sm:$0xff]  ;;  %v5539_v38 = vsub.s32 0, %v5536_v37 }
  0x19   : > { %4283 = vmatprep.mubr.msk.f32.mxu1 %vm395_vm0, %v385_v5  ;;  %v516_v19 = vld [vmem:[%s6518_s3 + $0x40] sm:$0xff]  ;;  %v514_v21 = vld [vmem:[%s6518_s3 + $0x30] sm:$0xff]  ;;  %v513_v27 = vld [vmem:[%s6518_s3 + $0x28] sm:$0xff]  ;;  %v5547_v40 = vsub.s32 1, %v5536_v37  ;;  %vm1004_vm6 = vcmask 1044480   ;;  %vm1000_vm7 = vcmask 39936  }
  0x1a   : > { %438 = vmatpush1.xpose.msra.mxu1 %v390_v3  ;;  %v512_v28 = vld [vmem:[%s6518_s3 + $0x20] sm:$0xff]  ;;  %v511_v29 = vld [vmem:[%s6518_s3 + $0x18] sm:$0xff]  ;;  %v510_v30 = vld [vmem:[%s6518_s3 + $0x10] sm:$0xff]  ;;  %vm1321_vm8 = vcmask 130048   ;;  %vm1323_vm9 = vcmask 195584   ;;  %s6543_s30 = smov 64  }
  0x1b   : > { %4281 = vmatprep.subr.msk.mxu1 %vm395_vm0, %v389_v4  ;;  %v509_v31 = vld [vmem:[%s6518_s3 + $0x8] sm:$0xff]  ;;  %v508_v32 = vld [vmem:[%s6518_s3] sm:$0xff]  ;;  %s6545_s14 = smov 16   ;;  %vm4046_vm10 = vcmask 253952  }
  0x1c   : > { %v5544_v39 = vld [vmem:[%s6522_s7] sm:$0xff] }
  0x1d   : > { %v501_v41 = vrot.slane %v5544_v39, %v5539_v38  ;;  %v506_v44 = vrot.slane %v5544_v39, %v5547_v40 }
  0x1e   : > { %440 = vmatpush1.xpose.msra.mxu1 %v388_v6 }
  0x1f   : > { %4282 = vmatprep.subr.msk.mxu1 %vm395_vm0, %v387_v7 }
  0x22   : > { %442 = vmatpush1.xpose.msra.mxu1 %v386_v8 }
  0x23   : > { %4722 = vmatprep.subr.mxu1 %v5308_v16 }
  0x25   : > { %476 = vmatmul.mubr.f32.vlgmr.msra.gmra.mxu1 %v384_v9 }
  0x26   : > { %4723 = vmatpush3.xpose.msk.msra.mxu1 %vm520_vm2, %v519_v15  ;;  %4746 = vmatprep.mubr.msk.f32.mxu1 %vm5309_vm3, %v5308_v16 }
  0x27   : > { %4724 = vmatprep.subr.mxu1 %v5308_v16 }
  0x2a   : > { %4725 = vmatpush3.xpose.msk.msra.mxu1 %vm520_vm2, %v518_v17 }
  0x2b   : > { %4726 = vmatprep.subr.mxu1 %v5308_v16 }
  0x2e   : > { %4727 = vmatpush3.xpose.msk.msra.mxu1 %vm520_vm2, %v517_v18 }
  0x2f   : > { %4728 = vmatprep.subr.mxu1 %v5308_v16 }
  0x32   : > { %4729 = vmatpush3.xpose.msk.msra.mxu1 %vm520_vm2, %v516_v19 }
  0x33   : > { %4730 = vmatprep.subr.mxu1 %v5308_v16 }
  0x36   : > { %4731 = vmatpush3.xpose.msk.msra.mxu1 %vm520_vm2, %v515_v20 }
  0x37   : > { %4732 = vmatprep.subr.mxu1 %v5308_v16 }
  0x3a   : > { %4733 = vmatpush3.xpose.msk.msra.mxu1 %vm520_vm2, %v514_v21 }
  0x3b   : > { %4734 = vmatprep.subr.mxu1 %v5308_v16 }
  0x3e   : > { %4735 = vmatpush3.xpose.msk.msra.mxu1 %vm520_vm2, %v513_v27 }
  0x3f   : > { %4736 = vmatprep.subr.mxu1 %v5308_v16 }
  0x42   : > { %4737 = vmatpush3.xpose.msk.msra.mxu1 %vm520_vm2, %v512_v28 }
  0x43   : > { %4738 = vmatprep.subr.mxu1 %v5308_v16 }
  0x46   : > { %4739 = vmatpush3.xpose.msk.msra.mxu1 %vm520_vm2, %v511_v29 }
  0x47   : > { %4740 = vmatprep.subr.mxu1 %v5308_v16 }
  0x4a   : > { %4741 = vmatpush3.xpose.msk.msra.mxu1 %vm520_vm2, %v510_v30 }
  0x4b   : > { %4742 = vmatprep.subr.mxu1 %v5308_v16 }
  0x4e   : > { %4743 = vmatpush3.xpose.msk.msra.mxu1 %vm520_vm2, %v509_v31 }
  0x4f   : > { %4744 = vmatprep.subr.mxu1 %v5308_v16 }
  0x52   : > { %4745 = vmatpush3.xpose.msk.msra.mxu1 %vm520_vm2, %v508_v32 }
  0x53   : > { %4800 = vmatprep.subr.mxu1 %v5308_v16 }
  0xe5   : > { %v477_v11 = vpop.f32.mrf.mxu1 }
  0xe6   : > { %v5464_v12 = vadd.f32 %v477_v11, %v394_v10 }
  0xe7   : > { %v479_v13 = vpop.f32.mrf.mxu1 }
  0xe8   : > { %v484_v14 = vsel %vm483_vm1, %v5464_v12, 0.0 }
  0xe9   : > { %485 = vadd.xlane.f32.xlu0 %v484_v14 }
 0x172   : > { %v486_v22 = vpop.xlane.xlu0 %485 }
 0x173   : > { %v488_v23 = vmul.f32 0.03125, %v486_v22 }
 0x175   : > { %v489_v24 = vsub.f32 %v5464_v12, %v488_v23 }
 0x177   : > { %v490_v25 = vmul.f32 %v489_v24, %v489_v24 }
 0x179   : > { %v491_v26 = vsel %vm483_vm1, %v490_v25, 0.0 }
 0x17a   : > { %492 = vadd.xlane.f32.xlu0 %v491_v26 }
 0x203   : > { %v493_v33 = vpop.xlane.xlu0 %492 }
 0x204   : > { %v494_v34 = vmul.f32 0.03125, %v493_v33 }
 0x206   : > { %v495_v35 = vadd.f32 1e-05, %v494_v34 }
 0x208   : > { %5178 = vrsqrt.f32 %v495_v35 }
 0x215   : > { %v5179_v42 = vpop.eup %5178 }
 0x216   : > { %v497_v43 = vmul.f32 %v5179_v42, %v489_v24 }
 0x218   : > { %v502_v45 = vmul.f32 %v501_v41, %v497_v43 }
 0x21a   : > { %v507_v46 = vadd.f32 %v506_v44, %v502_v45 }
 0x21c   : > { %4747 = vmatmul.mubr.msk.f32.vlgmr.msra.gmra.mxu1 %vm520_vm2, %v507_v46 }
 0x21d   : > { %4832 = vmatprep.mubr.msk.f32.mxu1 %vm5309_vm3, %v5308_v16 }
 0x2dc   : > { %v626_v47 = vpop.f32.mrf.mxu1 }
 0x2dd   : > { %637 = vrot.lane.b32.xlu0 %v626_v47, %s6537_s15  ;;  %631 = vrot.lane.b32.xlu1 %v626_v47, %s6538_s22  ;;  %v640_v53 = vmul.f32 0.35355338, %v626_v47 }
 0x2de   : > { %v4748_v48 = vpop.f32.mrf.mxu1 }
 0x2e1   : > { %634 = vrot.lane.b32.xlu1 %v626_v47, %s6539_s24 }
 0x2e5   : > { %644 = vrot.lane.b32.xlu1 %v626_v47, %s6535_s16 }
 0x34f   : > { %v5560_v49 = vpop.permute.xlu1 %631  ;;  %v5568_v51 = vpop.permute.xlu0 %637 }
 0x350   : > { %722 = vrot.lane.b32.xlu1 %v5560_v49, %s6535_s16  ;;  %v641_v55 = vmul.f32 0.35355338, %v5560_v49  ;;  %v643_v59 = vmul.f32 0.35355338, %v5568_v51 }
 0x353   : > { %v5564_v50 = vpop.permute.xlu1 %634 }
 0x354   : > { %799 = vrot.lane.b32.xlu1 %v5564_v50, %s6535_s16  ;;  %v642_v57 = vmul.f32 0.35355338, %v5564_v50 }
 0x357   : > { %v645_v52 = vpop.permute.xlu1 %644 }
 0x358   : > { %876 = vrot.lane.b32.xlu1 %v5568_v51, %s6535_s16  ;;  %4750 = vmatpush3.xpose.msk.msra.mxu0 %vm646_vm4, %v645_v52 }
 0x359   : > { %4754 = vmatprep.subr.mxu0 %v5308_v16 }
 0x35b   : > { %4752 = vmatmul.mubr.msk.f32.vlgmr.msra.gmra.mxu0 %vm646_vm4, %v640_v53 }
 0x35c   : > { %4756 = vmatprep.mubr.msk.f32.mxu0 %vm5309_vm3, %v5308_v16 }
 0x3c2   : > { %v723_v54 = vpop.permute.xlu1 %722 }
 0x3c3   : > { %4755 = vmatpush3.xpose.msk.msra.mxu0 %vm646_vm4, %v723_v54  ;;  %v1326_v54 = vld [vmem:[%s6519_s4 + $0x8] sm:$0xff] }
 0x3c4   : > { %4759 = vmatprep.subr.mxu0 %v5308_v16 }
 0x3c6   : > { %v800_v56 = vpop.permute.xlu1 %799  ;;  %4757 = vmatmul.mubr.msk.f32.vlgmr.msra.gmra.mxu0 %vm646_vm4, %v641_v55  ;;  %v1325_v55 = vld [vmem:[%s6519_s4] sm:$0xff] }
 0x3c7   : > { %4760 = vmatpush3.xpose.msk.msra.mxu0 %vm646_vm4, %v800_v56  ;;  %4761 = vmatprep.mubr.msk.f32.mxu0 %vm5309_vm3, %v5308_v16 }
 0x3c8   : > { %4764 = vmatprep.subr.mxu0 %v5308_v16 }
 0x3ca   : > { %v877_v58 = vpop.permute.xlu1 %876  ;;  %4762 = vmatmul.mubr.msk.f32.vlgmr.msra.gmra.mxu0 %vm646_vm4, %v642_v57 }
 0x3cb   : > { %4765 = vmatpush3.xpose.msk.msra.mxu0 %vm646_vm4, %v877_v58  ;;  %4766 = vmatprep.mubr.msk.f32.mxu0 %vm5309_vm3, %v5308_v16 }
 0x3cc   : > { %4769 = vmatprep.subr.mxu0 %v5308_v16 }
 0x3ce   : > { %4767 = vmatmul.mubr.msk.f32.vlgmr.msra.gmra.mxu0 %vm646_vm4, %v643_v59 }
 0x3cf   : > { %4771 = vmatprep.mubr.msk.f32.mxu0 %vm5309_vm3, %v5308_v16 }
 0x41b   : > { %v718_v60 = vpop.f32.mrf.mxu0 }
 0x41c   : > { %v954_v61 = vsel %vm953_vm5, %v718_v60, -inf }
 0x41d   : > { %955 = vmax.xlane.f32.xlu1 %v954_v61  ;;  %v4753_v62 = vpop.f32.mrf.mxu0 }
 0x486   : > { %v795_v63 = vpop.f32.mrf.mxu0 }
 0x487   : > { %v957_v0 = vsel %vm953_vm5, %v795_v63, -inf }
 0x488   : > { %958 = vmax.xlane.f32.xlu0 %v957_v0  ;;  %v4758_v1 = vpop.f32.mrf.mxu0 }
 0x48a   : > { %v872_v2 = vpop.f32.mrf.mxu0 }
 0x48b   : > { %v960_v3 = vsel %vm953_vm5, %v872_v2, -inf }
 0x48c   : > { %961 = vmax.xlane.f32.xlu1 %v960_v3  ;;  %v4763_v4 = vpop.f32.mrf.mxu0 }
 0x48d   : > { %v5660_v4 = vsub.s32 4, %v5536_v37 }
 0x48e   : > { %v949_v5 = vpop.f32.mrf.mxu0 }
 0x48f   : > { %v963_v6 = vsel %vm953_vm5, %v949_v5, -inf }
 0x490   : > { %964 = vmax.xlane.f32.xlu0 %v963_v6  ;;  %v4768_v7 = vpop.f32.mrf.mxu0 }
 0x49d   : > { %998 = vrot.lane.b32.xlu1 %v626_v47, %s6533_s25 }
 0x4a6   : > { %v956_v8 = vpop.xlane.xlu1 %955 }
 0x4a7   : > { %v966_v9 = vsub.f32 %v718_v60, %v956_v8 }
 0x4a9   : > { %v970_v10 = vmul.f32 1.442695, %v966_v9 }
 0x4ab   : > { %5180 = vpow2.f32 %v970_v10 }
 0x4b8   : > { %v5181_v11 = vpop.eup %5180 }
 0x4b9   : > { %v978_v13 = vsel %vm953_vm5, %v5181_v11, 0.0 }
 0x4c1   : > { %979 = vadd.xlane.f32.xlu1 %v978_v13  ;;  %v1457_v13 = vld [vmem:[%s6520_s5 + $0x70] sm:$0xff] }
 0x511   : > { %v959_v14 = vpop.xlane.xlu0 %958 }
 0x512   : > { %v967_v15 = vsub.f32 %v795_v63, %v959_v14  ;;  %v1455_v14 = vld [vmem:[%s6520_s5 + $0x60] sm:$0xff] }
 0x514   : > { %v972_v17 = vmul.f32 1.442695, %v967_v15  ;;  %v1454_v15 = vld [vmem:[%s6520_s5 + $0x58] sm:$0xff] }
 0x515   : > { %v962_v18 = vpop.xlane.xlu1 %961 }
 0x516   : > { %5182 = vpow2.f32 %v972_v17  ;;  %v968_v19 = vsub.f32 %v872_v2, %v962_v18  ;;  %v1453_v17 = vld [vmem:[%s6520_s5 + $0x50] sm:$0xff]  ;;  %v1452_v18 = vld [vmem:[%s6520_s5 + $0x48] sm:$0xff] }
 0x518   : > { %v974_v20 = vmul.f32 1.442695, %v968_v19  ;;  %v1451_v19 = vld [vmem:[%s6520_s5 + $0x40] sm:$0xff] }
 0x519   : > { %v999_v21 = vpop.permute.xlu1 %998  ;;  %v965_v22 = vpop.xlane.xlu0 %964 }
 0x51a   : > { %5184 = vpow2.f32 %v974_v20  ;;  %v969_v23 = vsub.f32 %v949_v5, %v965_v22  ;;  %4770 = vmatpush3.msk.msra.mxu0 %vm1004_vm6, %v999_v21  ;;  %v1418_v5 = vrot.slane %v5544_v39, %v5660_v4  ;;  %v1450_v20 = vld [vmem:[%s6520_s5 + $0x38] sm:$0xff]  ;;  %v1449_v21 = vld [vmem:[%s6520_s5 + $0x30] sm:$0xff] }
 0x51b   : > { %4774 = vmatprep.subr.mxu0 %v5308_v16 }
 0x51c   : > { %v976_v24 = vmul.f32 1.442695, %v969_v23 }
 0x51e   : > { %5186 = vpow2.f32 %v976_v24 }
 0x523   : > { %v5183_v25 = vpop.eup %5182 }
 0x524   : > { %v981_v26 = vsel %vm953_vm5, %v5183_v25, 0.0 }
 0x525   : > { %982 = vadd.xlane.f32.xlu0 %v981_v26 }
 0x527   : > { %v5185_v27 = vpop.eup %5184 }
 0x528   : > { %v984_v28 = vsel %vm953_vm5, %v5185_v27, 0.0 }
 0x529   : > { %985 = vadd.xlane.f32.xlu1 %v984_v28  ;;  %v1447_v28 = vld [vmem:[%s6520_s5 + $0x20] sm:$0xff] }
 0x52b   : > { %v5187_v29 = vpop.eup %5186 }
 0x52c   : > { %v987_v30 = vsel %vm953_vm5, %v5187_v29, 0.0 }
 0x52d   : > { %988 = vadd.xlane.f32.xlu0 %v987_v30  ;;  %v1445_v30 = vld [vmem:[%s6520_s5 + $0x10] sm:$0xff] }
 0x53a   : > { %1154 = vrot.lane.b32.xlu1 %v5564_v50, %s6533_s25  ;;  %v1328_v50 = vld [vmem:[%s6519_s4 + $0x18] sm:$0xff] }
 0x53e   : > { %1231 = vrot.lane.b32.xlu1 %v5568_v51, %s6533_s25  ;;  %v1327_v51 = vld [vmem:[%s6519_s4 + $0x10] sm:$0xff] }
 0x543   : > { %1077 = vrot.lane.b32.xlu0 %v5560_v49, %s6533_s25  ;;  %s6547_s25 = smov 112  }
 0x54a   : > { %v980_v31 = vpop.xlane.xlu1 %979 }
 0x54b   : > { %5188 = vrcp.f32 %v980_v31  ;;  %v1444_v31 = vld [vmem:[%s6520_s5 + $0x8] sm:$0xff] }
 0x558   : > { %v5189_v32 = vpop.eup %5188 }
 0x559   : > { %v994_v33 = vmul.f32 %v5189_v32, %v5181_v11  ;;  %v1458_v11 = vld [vmem:[%s6520_s5 + $0x78] sm:$0xff]  ;;  %v1443_v32 = vld [vmem:[%s6520_s5] sm:$0xff] }
 0x55a   : > { %4801 = vmatpush3.xpose.msk.msra.mxu1 %vm520_vm2, %v1458_v11 }
 0x55b   : > { %4772 = vmatmul.mubr.msk.f32.vlgmr.msra.gmra.mxu0 %vm1000_vm7, %v994_v33  ;;  %4802 = vmatprep.subr.mxu1 %v5308_v16 }
 0x55c   : > { %4776 = vmatprep.mubr.msk.f32.mxu0 %vm5309_vm3, %v5308_v16 }
 0x55e   : > { %4803 = vmatpush3.xpose.msk.msra.mxu1 %vm520_vm2, %v1457_v13 }
 0x55f   : > { %4804 = vmatprep.subr.mxu1 %v5308_v16 }
 0x5ae   : > { %v983_v34 = vpop.xlane.xlu0 %982 }
 0x5af   : > { %5190 = vrcp.f32 %v983_v34 }
 0x5b2   : > { %v986_v35 = vpop.xlane.xlu1 %985 }
 0x5b3   : > { %5192 = vrcp.f32 %v986_v35 }
 0x5b6   : > { %v989_v36 = vpop.xlane.xlu0 %988  ;;  %v1155_v43 = vpop.permute.xlu1 %1154 }
 0x5b7   : > { %5194 = vrcp.f32 %v989_v36  ;;  %v5752_v36 = vsub.s32 2, %v5536_v37 }
 0x5ba   : > { %v1078_v41 = vpop.permute.xlu0 %1077  ;;  %v1232_v47 = vpop.permute.xlu1 %1231 }
 0x5bb   : > { %4775 = vmatpush3.msk.msra.mxu0 %vm1004_vm6, %v1078_v41  ;;  %v5755_v41 = vsub.s32 3, %v5536_v37 }
 0x5bc   : > { %v5191_v42 = vpop.eup %5190  ;;  %4779 = vmatprep.subr.mxu0 %v5308_v16 }
 0x5bd   : > { %v995_v44 = vmul.f32 %v5191_v42, %v5183_v25  ;;  %v1436_v42 = vrot.slane %v5544_v39, %v5752_v36 }
 0x5bf   : > { %4777 = vmatmul.mubr.msk.f32.vlgmr.msra.gmra.mxu0 %vm1000_vm7, %v995_v44 }
 0x5c0   : > { %v5193_v45 = vpop.eup %5192  ;;  %4780 = vmatpush3.msk.msra.mxu0 %vm1004_vm6, %v1155_v43  ;;  %4781 = vmatprep.mubr.msk.f32.mxu0 %vm5309_vm3, %v5308_v16 }
 0x5c1   : > { %4784 = vmatprep.subr.mxu0 %v5308_v16  ;;  %v996_v46 = vmul.f32 %v5193_v45, %v5185_v27  ;;  %v1448_v27 = vld [vmem:[%s6520_s5 + $0x28] sm:$0xff]  ;;  %v1441_v45 = vrot.slane %v5544_v39, %v5755_v41 }
 0x5c3   : > { %4782 = vmatmul.mubr.msk.f32.vlgmr.msra.gmra.mxu0 %vm1000_vm7, %v996_v46 }
 0x5c4   : > { %v5195_v48 = vpop.eup %5194  ;;  %4785 = vmatpush3.msk.msra.mxu0 %vm1004_vm6, %v1232_v47  ;;  %4786 = vmatprep.mubr.msk.f32.mxu0 %vm5309_vm3, %v5308_v16 }
 0x5c5   : > { %v997_v49 = vmul.f32 %v5195_v48, %v5187_v29  ;;  %4789 = vmatprep.subr.mxu0 %v5308_v16  ;;  %v1446_v29 = vld [vmem:[%s6520_s5 + $0x18] sm:$0xff] }
 0x5c6   : > { %v1594_v48 = vld [vmem:[%s6521_s6 + $0x18] sm:$0xff] }
 0x5c7   : > { %4787 = vmatmul.mubr.msk.f32.vlgmr.msra.gmra.mxu0 %vm1000_vm7, %v997_v49  ;;  %v1593_v49 = vld [vmem:[%s6521_s6 + $0x10] sm:$0xff] }
 0x5c8   : > { %4797 = vmatprep.mubr.msk.f32.mxu0 %vm5309_vm3, %v5308_v16  ;;  %4790 = vmatpush3.xpose.msk.msra.mxu0 %vm520_vm2, %v1328_v50  ;;  %v1592_v50 = vld [vmem:[%s6521_s6 + $0x8] sm:$0xff] }
 0x5c9   : > { %4791 = vmatprep.subr.mxu0 %v5308_v16 }
 0x5cc   : > { %4792 = vmatpush3.xpose.msk.msra.mxu0 %vm520_vm2, %v1327_v51  ;;  %v1591_v51 = vld [vmem:[%s6521_s6] sm:$0xff] }
 0x5cd   : > { %4793 = vmatprep.subr.mxu0 %v5308_v16 }
 0x5d0   : > { %4794 = vmatpush3.xpose.msk.msra.mxu0 %vm520_vm2, %v1326_v54 }
 0x5d1   : > { %4795 = vmatprep.subr.mxu0 %v5308_v16 }
 0x5d4   : > { %4796 = vmatpush3.xpose.msk.msra.mxu0 %vm520_vm2, %v1325_v55 }
 0x5d5   : > { %4835 = vmatprep.subr.mxu0 %v5308_v16 }
 0x61b   : > { %v1073_v52 = vpop.f32.mrf.mxu0 }
 0x61d   : > { %v4773_v53 = vpop.f32.mrf.mxu0 }
 0x67f   : > { %v1150_v56 = vpop.f32.mrf.mxu0 }
 0x680   : > { %1309 = vrot.lane.b32.xlu0 %v1150_v56, %s6531_s26 }
 0x681   : > { %v4778_v57 = vpop.f32.mrf.mxu0 }
 0x683   : > { %v1227_v58 = vpop.f32.mrf.mxu0 }
 0x684   : > { %1313 = vrot.lane.b32.xlu1 %v1227_v58, %s6529_s12  ;;  %s6544_s12 = smov 8  }
 0x685   : > { %v4783_v59 = vpop.f32.mrf.mxu0 }
 0x687   : > { %v1304_v60 = vpop.f32.mrf.mxu0 }
 0x688   : > { %1317 = vrot.lane.b32.xlu0 %v1304_v60, %s6527_s13 }
 0x689   : > { %v4788_v61 = vpop.f32.mrf.mxu0 }
 0x68a   : > { %v5786_v61 = vsub.s32 5, %v5536_v37  ;;  %v4348_v37 = vld [vmem:[%s6518_s3 + $0xb0] sm:$0xff] }
 0x6f2   : > { %v1310_v62 = vpop.permute.xlu0 %1309 }
 0x6f3   : > { %v1320_v0 = vsel %vm646_vm4, %v1073_v52, %v1310_v62  ;;  %v4318_v52 = vld [vmem:[%s6523_s8] ss:$0 sm:$0xff]  ;;  %v1669_v62 = vrot.slane %v5544_v39, %v5786_v61  ;;  %v4347_v39 = vld [vmem:[%s6518_s3 + $0xa8] sm:$0xff] }
 0x6f6   : > { %v1314_v63 = vpop.permute.xlu1 %1313 }
 0x6f7   : > { %v1322_v1 = vsel %vm1321_vm8, %v1320_v0, %v1314_v63 }
 0x6fa   : > { %v1318_v2 = vpop.permute.xlu0 %1317 }
 0x6fb   : > { %v1324_v3 = vsel %vm1323_vm9, %v1322_v1, %v1318_v2 }
 0x6fc   : > { %4798 = vmatmul.mubr.msk.f32.vlgmr.msra.gmra.mxu0 %vm520_vm2, %v1324_v3 }
 0x6fd   : > { %4843 = vmatprep.mubr.msk.f32.mxu0 %vm5309_vm3, %v5308_v16  ;;  %4836 = vmatpush3.xpose.msra.mxu0 %v1594_v48 }
 0x6fe   : > { %4837 = vmatprep.subr.mxu0 %v5308_v16 }
 0x701   : > { %4838 = vmatpush3.xpose.msra.mxu0 %v1593_v49 }
 0x702   : > { %4839 = vmatprep.subr.mxu0 %v5308_v16 }
 0x705   : > { %4840 = vmatpush3.xpose.msra.mxu0 %v1592_v50 }
 0x706   : > { %4841 = vmatprep.subr.mxu0 %v5308_v16 }
 0x709   : > { %4842 = vmatpush3.xpose.msra.mxu0 %v1591_v51 }
 0x70a   : > { %4846 = vmatprep.subr.mxu0 %v5308_v16 }
 0x7bc   : > { %v1410_v6 = vpop.f32.mrf.mxu0 }
 0x7bd   : > { %v1414_v7 = vadd.f32 %v1410_v6, %v5464_v12  ;;  %v1456_v12 = vld [vmem:[%s6520_s5 + $0x68] sm:$0xff]  ;;  %v4346_v6 = vld [vmem:[%s6518_s3 + $0xa0] sm:$0xff] }
 0x7be   : > { %v4799_v8 = vpop.f32.mrf.mxu0  ;;  %4805 = vmatpush3.xpose.msk.msra.mxu1 %vm520_vm2, %v1456_v12 }
 0x7bf   : > { %v5665_v9 = vadd.f32 %v1418_v5, %v1414_v7  ;;  %4806 = vmatprep.subr.mxu1 %v5308_v16  ;;  %v4349_v5 = vld [vmem:[%s6518_s3 + $0xb8] sm:$0xff]  ;;  %v4344_v8 = vld [vmem:[%s6518_s3 + $0x90] sm:$0xff] }
 0x7c0   : > { %v4345_v7 = vld [vmem:[%s6518_s3 + $0x98] sm:$0xff] }
 0x7c1   : > { %v1420_v10 = vsel %vm483_vm1, %v5665_v9, 0.0 }
 0x7c2   : > { %1421 = vadd.xlane.f32.xlu1 %v1420_v10  ;;  %4807 = vmatpush3.xpose.msk.msra.mxu1 %vm520_vm2, %v1455_v14  ;;  %v4343_v14 = vld [vmem:[%s6518_s3 + $0x88] sm:$0xff] }
 0x7c3   : > { %4808 = vmatprep.subr.mxu1 %v5308_v16 }
 0x7c6   : > { %4809 = vmatpush3.xpose.msk.msra.mxu1 %vm520_vm2, %v1454_v15  ;;  %v4342_v15 = vld [vmem:[%s6518_s3 + $0x80] sm:$0xff] }
 0x7c7   : > { %4810 = vmatprep.subr.mxu1 %v5308_v16 }
 0x7ca   : > { %4811 = vmatpush3.xpose.msk.msra.mxu1 %vm520_vm2, %v1453_v17  ;;  %v4341_v17 = vld [vmem:[%s6518_s3 + $0x78] sm:$0xff] }
 0x7cb   : > { %4812 = vmatprep.subr.mxu1 %v5308_v16 }
 0x7ce   : > { %4813 = vmatpush3.xpose.msk.msra.mxu1 %vm520_vm2, %v1452_v18  ;;  %v4340_v18 = vld [vmem:[%s6518_s3 + $0x70] sm:$0xff] }
 0x7cf   : > { %4814 = vmatprep.subr.mxu1 %v5308_v16 }
 0x7d2   : > { %4815 = vmatpush3.xpose.msk.msra.mxu1 %vm520_vm2, %v1451_v19  ;;  %v4339_v19 = vld [vmem:[%s6518_s3 + $0x68] sm:$0xff] }
 0x7d3   : > { %4816 = vmatprep.subr.mxu1 %v5308_v16 }
 0x7d6   : > { %4817 = vmatpush3.xpose.msk.msra.mxu1 %vm520_vm2, %v1450_v20  ;;  %v4338_v20 = vld [vmem:[%s6518_s3 + $0x60] sm:$0xff] }
 0x7d7   : > { %4818 = vmatprep.subr.mxu1 %v5308_v16 }
 0x7da   : > { %4819 = vmatpush3.xpose.msk.msra.mxu1 %vm520_vm2, %v1449_v21 }
 0x7db   : > { %4820 = vmatprep.subr.mxu1 %v5308_v16 }
 0x7de   : > { %4821 = vmatpush3.xpose.msk.msra.mxu1 %vm520_vm2, %v1448_v27 }
 0x7df   : > { %4822 = vmatprep.subr.mxu1 %v5308_v16 }
 0x7e2   : > { %4823 = vmatpush3.xpose.msk.msra.mxu1 %vm520_vm2, %v1447_v28 }
 0x7e3   : > { %4824 = vmatprep.subr.mxu1 %v5308_v16 }
 0x7e6   : > { %4825 = vmatpush3.xpose.msk.msra.mxu1 %vm520_vm2, %v1446_v29 }
 0x7e7   : > { %4826 = vmatprep.subr.mxu1 %v5308_v16 }
 0x7ea   : > { %4827 = vmatpush3.xpose.msk.msra.mxu1 %vm520_vm2, %v1445_v30 }
 0x7eb   : > { %4828 = vmatprep.subr.mxu1 %v5308_v16 }
 0x7ee   : > { %4829 = vmatpush3.xpose.msk.msra.mxu1 %vm520_vm2, %v1444_v31 }
 0x7ef   : > { %4830 = vmatprep.subr.mxu1 %v5308_v16 }
 0x7f2   : > { %4831 = vmatpush3.xpose.msk.msra.mxu1 %vm520_vm2, %v1443_v32 }
 0x7f3   : > { %4873 = vmatprep.subr.mxu1 %v5308_v16 }
 0x84b   : > { %v1422_v22 = vpop.xlane.xlu1 %1421 }
 0x84c   : > { %v1423_v23 = vmul.f32 0.03125, %v1422_v22 }
 0x84e   : > { %v1424_v24 = vsub.f32 %v5665_v9, %v1423_v23 }
 0x850   : > { %v1425_v25 = vmul.f32 %v1424_v24, %v1424_v24 }
 0x852   : > { %v1426_v26 = vsel %vm483_vm1, %v1425_v25, 0.0 }
 0x853   : > { %1427 = vadd.xlane.f32.xlu0 %v1426_v26 }
 0x8dc   : > { %v1428_v33 = vpop.xlane.xlu0 %1427 }
 0x8dd   : > { %v1429_v34 = vmul.f32 0.03125, %v1428_v33 }
 0x8df   : > { %v1430_v35 = vadd.f32 1e-05, %v1429_v34 }
 0x8e1   : > { %5196 = vrsqrt.f32 %v1430_v35 }
 0x8ee   : > { %v5197_v43 = vpop.eup %5196 }
 0x8ef   : > { %v1432_v44 = vmul.f32 %v5197_v43, %v1424_v24  ;;  %v5860_v24 = vld [vmem:[%s6522_s7 + $0x8] sm:$0xff] }
 0x8f0   : > { %v1691_v25 = vrot.slane %v5860_v24, %v5539_v38  ;;  %v1696_v28 = vrot.slane %v5860_v24, %v5547_v40 }
 0x8f1   : > { %v1437_v46 = vmul.f32 %v1436_v42, %v1432_v44 }
 0x8f3   : > { %v1442_v47 = vadd.f32 %v1441_v45, %v1437_v46 }
 0x8f5   : > { %4833 = vmatmul.mubr.msk.f32.vlgmr.msra.gmra.mxu1 %vm520_vm2, %v1442_v47 }
 0x8f6   : > { %4875 = vmatprep.mubr.msk.f32.mxu1 %vm5309_vm3, %v5308_v16 }
 0x9b5   : > { %v1582_v53 = vpop.f32.mrf.mxu1 }
 0x9b6   : > { %v1583_v54 = vadd.f32 %v4318_v52, %v1582_v53 }
 0x9b7   : > { %v4834_v55 = vpop.f32.mrf.mxu1 }
 0x9b8   : > { %v1587_v56 = vmul.f32 0.70710677, %v1583_v54  ;;  %v1586_v58 = vmul.f32 0.5, %v1583_v54 }
 0x9ba   : > { %5198 = verf.f32 %v1587_v56 }
 0x9c7   : > { %v5199_v57 = vpop.eup %5198 }
 0x9c8   : > { %v1589_v59 = vadd.f32 1.0, %v5199_v57 }
 0x9ca   : > { %v1590_v60 = vmul.f32 %v1589_v59, %v1586_v58 }
 0x9cc   : > { %4844 = vmatmul.mubr.f32.vlgmr.msra.gmra.mxu0 %v1590_v60 }
 0x9cd   : > { %4870 = vmatprep.mubr.msk.f32.mxu0 %vm5309_vm3, %v5308_v16  ;;  %4847 = vmatpush3.xpose.msk.msra.mxu0 %vm520_vm2, %v4349_v5 }
 0x9ce   : > { %4848 = vmatprep.subr.mxu0 %v5308_v16 }
 0x9d1   : > { %4849 = vmatpush3.xpose.msk.msra.mxu0 %vm520_vm2, %v4348_v37 }
 0x9d2   : > { %4850 = vmatprep.subr.mxu0 %v5308_v16 }
 0x9d5   : > { %4851 = vmatpush3.xpose.msk.msra.mxu0 %vm520_vm2, %v4347_v39 }
 0x9d6   : > { %4852 = vmatprep.subr.mxu0 %v5308_v16 }
 0x9d9   : > { %4853 = vmatpush3.xpose.msk.msra.mxu0 %vm520_vm2, %v4346_v6 }
 0x9da   : > { %4854 = vmatprep.subr.mxu0 %v5308_v16 }
 0x9dd   : > { %4855 = vmatpush3.xpose.msk.msra.mxu0 %vm520_vm2, %v4345_v7 }
 0x9de   : > { %4856 = vmatprep.subr.mxu0 %v5308_v16 }
 0x9e1   : > { %4857 = vmatpush3.xpose.msk.msra.mxu0 %vm520_vm2, %v4344_v8 }
 0x9e2   : > { %4858 = vmatprep.subr.mxu0 %v5308_v16 }
 0x9e5   : > { %4859 = vmatpush3.xpose.msk.msra.mxu0 %vm520_vm2, %v4343_v14 }
 0x9e6   : > { %4860 = vmatprep.subr.mxu0 %v5308_v16 }
 0x9e9   : > { %4861 = vmatpush3.xpose.msk.msra.mxu0 %vm520_vm2, %v4342_v15 }
 0x9ea   : > { %4862 = vmatprep.subr.mxu0 %v5308_v16 }
 0x9ed   : > { %4863 = vmatpush3.xpose.msk.msra.mxu0 %vm520_vm2, %v4341_v17 }
 0x9ee   : > { %4864 = vmatprep.subr.mxu0 %v5308_v16 }
 0x9f1   : > { %4865 = vmatpush3.xpose.msk.msra.mxu0 %vm520_vm2, %v4340_v18 }
 0x9f2   : > { %4866 = vmatprep.subr.mxu0 %v5308_v16 }
 0x9f5   : > { %4867 = vmatpush3.xpose.msk.msra.mxu0 %vm520_vm2, %v4339_v19 }
 0x9f6   : > { %4868 = vmatprep.subr.mxu0 %v5308_v16 }
 0x9f9   : > { %4869 = vmatpush3.xpose.msk.msra.mxu0 %vm520_vm2, %v4338_v20 }
 0x9fa   : > { %4893 = vmatprep.subr.mxu0 %v5308_v16 }
 0xa8c   : > { %v1661_v63 = vpop.f32.mrf.mxu0 }
 0xa8d   : > { %v1665_v0 = vadd.f32 %v1661_v63, %v5665_v9 }
 0xa8e   : > { %v4845_v1 = vpop.f32.mrf.mxu0 }
 0xa8f   : > { %v5791_v2 = vadd.f32 %v1669_v62, %v1665_v0 }
 0xa91   : > { %v1675_v3 = vsel %vm483_vm1, %v5791_v2, 0.0 }
 0xa92   : > { %1676 = vadd.xlane.f32.xlu0 %v1675_v3 }
 0xb1b   : > { %v1677_v9 = vpop.xlane.xlu0 %1676 }
 0xb1c   : > { %v1678_v10 = vmul.f32 0.03125, %v1677_v9 }
 0xb1e   : > { %v1679_v11 = vsub.f32 %v5791_v2, %v1678_v10 }
 0xb20   : > { %v1680_v13 = vmul.f32 %v1679_v11, %v1679_v11 }
 0xb22   : > { %v1681_v12 = vsel %vm483_vm1, %v1680_v13, 0.0 }
 0xb23   : > { %1682 = vadd.xlane.f32.xlu1 %v1681_v12 }
 0xbac   : > { %v1683_v21 = vpop.xlane.xlu1 %1682 }
 0xbad   : > { %v1684_v22 = vmul.f32 0.03125, %v1683_v21 }
 0xbaf   : > { %v1685_v23 = vadd.f32 1e-05, %v1684_v22 }
 0xbb1   : > { %5200 = vrsqrt.f32 %v1685_v23 }
 0xbbe   : > { %v5201_v26 = vpop.eup %5200 }
 0xbbf   : > { %v1687_v27 = vmul.f32 %v5201_v26, %v1679_v11 }
 0xbc1   : > { %v1692_v29 = vmul.f32 %v1691_v25, %v1687_v27 }
 0xbc3   : > { %v1697_v30 = vadd.f32 %v1696_v28, %v1692_v29 }
 0xbc5   : > { %4871 = vmatmul.mubr.msk.f32.vlgmr.msra.gmra.mxu0 %vm520_vm2, %v1697_v30 }
 0xbc6   : > { %4895 = vmatprep.mubr.msk.f32.mxu0 %vm5309_vm3, %v5308_v16 }
 0xc85   : > { %v1816_v31 = vpop.f32.mrf.mxu0 }
 0xc86   : > { %1824 = vrot.lane.b32.xlu1 %v1816_v31, %s6539_s24  ;;  %1821 = vrot.lane.b32.xlu0 %v1816_v31, %s6538_s22  ;;  %v1830_v43 = vmul.f32 0.35355338, %v1816_v31  ;;  %s6549_s24 = smov 104   ;;  %s6550_s22 = smov 96  }
 0xc87   : > { %v4872_v32 = vpop.f32.mrf.mxu0 }
 0xc8a   : > { %1827 = vrot.lane.b32.xlu1 %v1816_v31, %s6537_s15  ;;  %1834 = vrot.lane.b32.xlu0 %v1816_v31, %s6535_s16  ;;  %s6548_s15 = smov 120  }
 0xcf8   : > { %v5873_v33 = vpop.permute.xlu1 %1824  ;;  %v5875_v34 = vpop.permute.xlu0 %1821 }
 0xcf9   : > { %1988 = vrot.lane.b32.xlu0 %v5873_v33, %s6535_s16  ;;  %1911 = vrot.lane.b32.xlu1 %v5875_v34, %s6535_s16  ;;  %v1831_v45 = vmul.f32 0.35355338, %v5875_v34  ;;  %v1832_v47 = vmul.f32 0.35355338, %v5873_v33 }
 0xcfc   : > { %v5881_v35 = vpop.permute.xlu1 %1827  ;;  %v1835_v42 = vpop.permute.xlu0 %1834 }
 0xcfd   : > { %2065 = vrot.lane.b32.xlu1 %v5881_v35, %s6535_s16  ;;  %4874 = vmatpush3.xpose.msk.msra.mxu1 %vm646_vm4, %v1835_v42  ;;  %v1833_v49 = vmul.f32 0.35355338, %v5881_v35 }
 0xcfe   : > { %4878 = vmatprep.subr.mxu1 %v5308_v16 }
 0xd00   : > { %4876 = vmatmul.mubr.msk.f32.vlgmr.msra.gmra.mxu1 %vm646_vm4, %v1830_v43  ;;  %v4382_v43 = vld [vmem:[%s6519_s4 + $0x38] sm:$0xff] }
 0xd01   : > { %4880 = vmatprep.mubr.msk.f32.mxu1 %vm5309_vm3, %v5308_v16 }
 0xd6b   : > { %v1912_v44 = vpop.permute.xlu1 %1911  ;;  %v1989_v46 = vpop.permute.xlu0 %1988 }
 0xd6c   : > { %4879 = vmatpush3.xpose.msk.msra.mxu1 %vm646_vm4, %v1912_v44  ;;  %v4381_v44 = vld [vmem:[%s6519_s4 + $0x30] sm:$0xff] }
 0xd6d   : > { %4883 = vmatprep.subr.mxu1 %v5308_v16 }
 0xd6f   : > { %4881 = vmatmul.mubr.msk.f32.vlgmr.msra.gmra.mxu1 %vm646_vm4, %v1831_v45  ;;  %v2066_v48 = vpop.permute.xlu1 %2065 }
 0xd70   : > { %4884 = vmatpush3.xpose.msk.msra.mxu1 %vm646_vm4, %v1989_v46  ;;  %4885 = vmatprep.mubr.msk.f32.mxu1 %vm5309_vm3, %v5308_v16 }
 0xd71   : > { %4888 = vmatprep.subr.mxu1 %v5308_v16 }
 0xd73   : > { %4886 = vmatmul.mubr.msk.f32.vlgmr.msra.gmra.mxu1 %vm646_vm4, %v1832_v47  ;;  %v4380_v47 = vld [vmem:[%s6519_s4 + $0x28] sm:$0xff] }
 0xd74   : > { %4889 = vmatpush3.xpose.msk.msra.mxu1 %vm646_vm4, %v2066_v48  ;;  %4890 = vmatprep.mubr.msk.f32.mxu1 %vm5309_vm3, %v5308_v16  ;;  %v4379_v48 = vld [vmem:[%s6519_s4 + $0x20] sm:$0xff] }
 0xd75   : > { %4898 = vmatprep.subr.mxu1 %v5308_v16 }
 0xd77   : > { %4891 = vmatmul.mubr.msk.f32.vlgmr.msra.gmra.mxu1 %vm646_vm4, %v1833_v49 }
 0xd78   : > { %4900 = vmatprep.mubr.msk.f32.mxu1 %vm5309_vm3, %v5308_v16 }
 0xdc0   : > { %v1907_v50 = vpop.f32.mrf.mxu1 }
 0xdc1   : > { %v2142_v51 = vsel %vm953_vm5, %v1907_v50, -inf }
 0xdc2   : > { %2143 = vmax.xlane.f32.xlu0 %v2142_v51  ;;  %v4877_v52 = vpop.f32.mrf.mxu1 }
 0xe2f   : > { %v1984_v53 = vpop.f32.mrf.mxu1 }
 0xe30   : > { %v2145_v54 = vsel %vm953_vm5, %v1984_v53, -inf }
 0xe31   : > { %2146 = vmax.xlane.f32.xlu1 %v2145_v54  ;;  %v4882_v55 = vpop.f32.mrf.mxu1 }
 0xe33   : > { %v2061_v56 = vpop.f32.mrf.mxu1 }
 0xe34   : > { %v2148_v57 = vsel %vm953_vm5, %v2061_v56, -inf }
 0xe35   : > { %2149 = vmax.xlane.f32.xlu0 %v2148_v57  ;;  %v4887_v58 = vpop.f32.mrf.mxu1 }
 0xe37   : > { %v2138_v59 = vpop.f32.mrf.mxu1 }
 0xe38   : > { %v2151_v60 = vsel %vm953_vm5, %v2138_v59, -inf }
 0xe39   : > { %2152 = vmax.xlane.f32.xlu0 %v2151_v60  ;;  %v4892_v62 = vpop.f32.mrf.mxu1 }
 0xe3a   : > { %v2603_v62 = vrot.slane %v5860_v24, %v5660_v4 }
 0xe42   : > { %2186 = vrot.lane.b32.xlu1 %v1816_v31, %s6543_s30 }
 0xe4b   : > { %v2144_v63 = vpop.xlane.xlu0 %2143 }
 0xe4c   : > { %v2154_v0 = vsub.f32 %v1907_v50, %v2144_v63 }
 0xe4e   : > { %v2158_v1 = vmul.f32 1.442695, %v2154_v0 }
 0xe50   : > { %5202 = vpow2.f32 %v2158_v1 }
 0xe5d   : > { %v5203_v3 = vpop.eup %5202 }
 0xe5e   : > { %v2166_v5 = vsel %vm953_vm5, %v5203_v3, 0.0 }
 0xe66   : > { %2167 = vadd.xlane.f32.xlu1 %v2166_v5 }
 0xeba   : > { %v2147_v37 = vpop.xlane.xlu1 %2146 }
 0xebb   : > { %v2155_v39 = vsub.f32 %v1984_v53, %v2147_v37  ;;  %v4403_v37 = vld [vmem:[%s6520_s5 + $0xf8] sm:$0xff] }
 0xebd   : > { %v2160_v6 = vmul.f32 1.442695, %v2155_v39  ;;  %v4402_v39 = vld [vmem:[%s6520_s5 + $0xf0] sm:$0xff] }
 0xebe   : > { %v2187_v7 = vpop.permute.xlu1 %2186  ;;  %v2150_v8 = vpop.xlane.xlu0 %2149 }
 0xebf   : > { %5204 = vpow2.f32 %v2160_v6  ;;  %v2156_v9 = vsub.f32 %v2061_v56, %v2150_v8  ;;  %4894 = vmatpush3.msk.msra.mxu0 %vm1004_vm6, %v2187_v7  ;;  %v4400_v6 = vld [vmem:[%s6520_s5 + $0xe0] sm:$0xff]  ;;  %v4399_v7 = vld [vmem:[%s6520_s5 + $0xd8] sm:$0xff]  ;;  %v4398_v8 = vld [vmem:[%s6520_s5 + $0xd0] sm:$0xff] }
 0xec0   : > { %4903 = vmatprep.subr.mxu0 %v5308_v16 }
 0xec1   : > { %v2162_v10 = vmul.f32 1.442695, %v2156_v9  ;;  %v4397_v9 = vld [vmem:[%s6520_s5 + $0xc8] sm:$0xff] }
 0xec2   : > { %v2153_v11 = vpop.xlane.xlu0 %2152 }
 0xec3   : > { %5206 = vpow2.f32 %v2162_v10  ;;  %v2157_v13 = vsub.f32 %v2138_v59, %v2153_v11  ;;  %v4396_v10 = vld [vmem:[%s6520_s5 + $0xc0] sm:$0xff]  ;;  %v4395_v11 = vld [vmem:[%s6520_s5 + $0xb8] sm:$0xff] }
 0xec5   : > { %v2164_v12 = vmul.f32 1.442695, %v2157_v13  ;;  %v4394_v13 = vld [vmem:[%s6520_s5 + $0xb0] sm:$0xff] }
 0xec7   : > { %5208 = vpow2.f32 %v2164_v12 }
 0xecc   : > { %v5205_v14 = vpop.eup %5204 }
 0xecd   : > { %v2169_v15 = vsel %vm953_vm5, %v5205_v14, 0.0 }
 0xece   : > { %2170 = vadd.xlane.f32.xlu0 %v2169_v15 }
 0xed0   : > { %v5207_v17 = vpop.eup %5206 }
 0xed1   : > { %v2172_v18 = vsel %vm953_vm5, %v5207_v17, 0.0 }
 0xed2   : > { %2173 = vadd.xlane.f32.xlu1 %v2172_v18 }
 0xed4   : > { %v5209_v19 = vpop.eup %5208 }
 0xed5   : > { %v2175_v20 = vsel %vm953_vm5, %v5209_v19, 0.0 }
 0xed6   : > { %2176 = vadd.xlane.f32.xlu0 %v2175_v20  ;;  %v4392_v20 = vld [vmem:[%s6520_s5 + $0xa0] sm:$0xff] }
 0xee3   : > { %2340 = vrot.lane.b32.xlu1 %v5873_v33, %s6543_s30 }
 0xee7   : > { %2417 = vrot.lane.b32.xlu1 %v5881_v35, %s6543_s30 }
 0xeec   : > { %2263 = vrot.lane.b32.xlu0 %v5875_v34, %s6543_s30 }
 0xeef   : > { %v2168_v21 = vpop.xlane.xlu1 %2167 }
 0xef0   : > { %5210 = vrcp.f32 %v2168_v21  ;;  %v4391_v21 = vld [vmem:[%s6520_s5 + $0x98] sm:$0xff] }
 0xefd   : > { %v5211_v22 = vpop.eup %5210 }
 0xefe   : > { %v2182_v23 = vmul.f32 %v5211_v22, %v5203_v3  ;;  %v4390_v22 = vld [vmem:[%s6520_s5 + $0x90] sm:$0xff] }
 0xf00   : > { %4896 = vmatmul.mubr.msk.f32.vlgmr.msra.gmra.mxu0 %vm1000_vm7, %v2182_v23  ;;  %v4389_v23 = vld [vmem:[%s6520_s5 + $0x88] sm:$0xff] }
 0xf01   : > { %4905 = vmatprep.mubr.msk.f32.mxu0 %vm5309_vm3, %v5308_v16 }
 0xf57   : > { %v2171_v25 = vpop.xlane.xlu0 %2170 }
 0xf58   : > { %5212 = vrcp.f32 %v2171_v25  ;;  %v4388_v25 = vld [vmem:[%s6520_s5 + $0x80] sm:$0xff] }
 0xf5b   : > { %v2174_v26 = vpop.xlane.xlu1 %2173 }
 0xf5c   : > { %5214 = vrcp.f32 %v2174_v26 }
 0xf5f   : > { %v2341_v27 = vpop.permute.xlu1 %2340  ;;  %v2177_v28 = vpop.xlane.xlu0 %2176 }
 0xf60   : > { %5216 = vrcp.f32 %v2177_v28  ;;  %4904 = vmatpush3.msk.msra.mxu0 %vm1004_vm6, %v2341_v27 }
 0xf61   : > { %4913 = vmatprep.subr.mxu0 %v5308_v16 }
 0xf63   : > { %v2264_v29 = vpop.permute.xlu0 %2263  ;;  %v2418_v32 = vpop.permute.xlu1 %2417 }
 0xf64   : > { %4899 = vmatpush3.msk.msra.mxu1 %vm1004_vm6, %v2264_v29  ;;  %v2621_v29 = vrot.slane %v5860_v24, %v5752_v36 }
 0xf65   : > { %v5213_v30 = vpop.eup %5212  ;;  %4908 = vmatprep.subr.mxu1 %v5308_v16 }
 0xf66   : > { %v2183_v31 = vmul.f32 %v5213_v30, %v5205_v14 }
 0xf68   : > { %4901 = vmatmul.mubr.msk.f32.vlgmr.msra.gmra.mxu1 %vm1000_vm7, %v2183_v31 }
 0xf69   : > { %v5215_v33 = vpop.eup %5214  ;;  %4909 = vmatpush3.msk.msra.mxu1 %vm1004_vm6, %v2418_v32  ;;  %4910 = vmatprep.mubr.msk.f32.mxu1 %vm5309_vm3, %v5308_v16  ;;  %v2626_v32 = vrot.slane %v5860_v24, %v5755_v41 }
 0xf6a   : > { %v2184_v34 = vmul.f32 %v5215_v33, %v5207_v17  ;;  %4924 = vmatprep.subr.mxu1 %v5308_v16 }
 0xf6c   : > { %4906 = vmatmul.mubr.msk.f32.vlgmr.msra.gmra.mxu0 %vm1000_vm7, %v2184_v34 }
 0xf6d   : > { %v5217_v35 = vpop.eup %5216  ;;  %4921 = vmatprep.mubr.msk.f32.mxu0 %vm5309_vm3, %v5308_v16  ;;  %4914 = vmatpush3.xpose.msk.msra.mxu0 %vm520_vm2, %v4382_v43  ;;  %v4423_v43 = vld [vmem:[%s6521_s6 + $0x28] sm:$0xff] }
 0xf6e   : > { %v2185_v42 = vmul.f32 %v5217_v35, %v5209_v19  ;;  %4915 = vmatprep.subr.mxu0 %v5308_v16  ;;  %v4393_v19 = vld [vmem:[%s6520_s5 + $0xa8] sm:$0xff]  ;;  %v4425_v35 = vld [vmem:[%s6521_s6 + $0x38] sm:$0xff] }
 0xf70   : > { %4911 = vmatmul.mubr.msk.f32.vlgmr.msra.gmra.mxu1 %vm1000_vm7, %v2185_v42  ;;  %v4424_v42 = vld [vmem:[%s6521_s6 + $0x30] sm:$0xff] }
 0xf71   : > { %4956 = vmatprep.mubr.msk.f32.mxu1 %vm5309_vm3, %v5308_v16  ;;  %4916 = vmatpush3.xpose.msk.msra.mxu0 %vm520_vm2, %v4381_v44  ;;  %v4422_v44 = vld [vmem:[%s6521_s6 + $0x20] sm:$0xff] }
 0xf72   : > { %4917 = vmatprep.subr.mxu0 %v5308_v16  ;;  %4925 = vmatpush3.xpose.msk.msra.mxu1 %vm520_vm2, %v4403_v37 }
 0xf73   : > { %4926 = vmatprep.subr.mxu1 %v5308_v16 }
 0xf75   : > { %4918 = vmatpush3.xpose.msk.msra.mxu0 %vm520_vm2, %v4380_v47 }
 0xf76   : > { %4919 = vmatprep.subr.mxu0 %v5308_v16  ;;  %4927 = vmatpush3.xpose.msk.msra.mxu1 %vm520_vm2, %v4402_v39 }
 0xf77   : > { %4928 = vmatprep.subr.mxu1 %v5308_v16 }
 0xf79   : > { %4920 = vmatpush3.xpose.msk.msra.mxu0 %vm520_vm2, %v4379_v48 }
 0xf7a   : > { %4959 = vmatprep.subr.mxu0 %v5308_v16 }
 0xfc0   : > { %v2259_v45 = vpop.f32.mrf.mxu0 }
 0xfc2   : > { %v4897_v46 = vpop.f32.mrf.mxu0 }
0x1028   : > { %v2336_v49 = vpop.f32.mrf.mxu1 }
0x1029   : > { %2495 = vrot.lane.b32.xlu0 %v2336_v49, %s6544_s12 }
0x102a   : > { %v4902_v50 = vpop.f32.mrf.mxu1 }
0x102c   : > { %v2413_v51 = vpop.f32.mrf.mxu0 }
0x102d   : > { %2499 = vrot.lane.b32.xlu1 %v2413_v51, %s6545_s14 }
0x102e   : > { %v4907_v52 = vpop.f32.mrf.mxu0 }
0x1030   : > { %v2490_v53 = vpop.f32.mrf.mxu1 }
0x1031   : > { %2503 = vrot.lane.b32.xlu0 %v2490_v53, %s6546_s29 }
0x1032   : > { %v4912_v54 = vpop.f32.mrf.mxu1 }
0x1033   : > { %v2856_v54 = vrot.slane %v5860_v24, %v5786_v61  ;;  %v4438_v24 = vld [vmem:[%s6518_s3 + $0x110] sm:$0xff] }
0x109b   : > { %v2496_v55 = vpop.permute.xlu0 %2495 }
0x109c   : > { %v2506_v57 = vsel %vm646_vm4, %v2259_v45, %v2496_v55  ;;  %v4404_v45 = vld [vmem:[%s6523_s8 + $0x1] ss:$0 sm:$0xff] }
0x109f   : > { %v2500_v56 = vpop.permute.xlu1 %2499 }
0x10a0   : > { %v2507_v58 = vsel %vm1321_vm8, %v2506_v57, %v2500_v56 }
0x10a3   : > { %v2504_v59 = vpop.permute.xlu0 %2503 }
0x10a4   : > { %v2508_v60 = vsel %vm1323_vm9, %v2507_v58, %v2504_v59 }
0x10a5   : > { %4922 = vmatmul.mubr.msk.f32.vlgmr.msra.gmra.mxu0 %vm520_vm2, %v2508_v60  ;;  %v4439_v60 = vld [vmem:[%s6518_s3 + $0x118] sm:$0xff] }
0x10a6   : > { %4967 = vmatprep.mubr.msk.f32.mxu0 %vm5309_vm3, %v5308_v16  ;;  %4960 = vmatpush3.xpose.msra.mxu0 %v4425_v35 }
0x10a7   : > { %4961 = vmatprep.subr.mxu0 %v5308_v16 }
0x10aa   : > { %4962 = vmatpush3.xpose.msra.mxu0 %v4424_v42 }
0x10ab   : > { %4963 = vmatprep.subr.mxu0 %v5308_v16 }
0x10ae   : > { %4964 = vmatpush3.xpose.msra.mxu0 %v4423_v43 }
0x10af   : > { %4965 = vmatprep.subr.mxu0 %v5308_v16 }
0x10b2   : > { %4966 = vmatpush3.xpose.msra.mxu0 %v4422_v44 }
0x10b3   : > { %4970 = vmatprep.subr.mxu0 %v5308_v16 }
0x1165   : > { %v2595_v63 = vpop.f32.mrf.mxu0 }
0x1166   : > { %v2599_v0 = vadd.f32 %v2595_v63, %v5791_v2  ;;  %v4401_v2 = vld [vmem:[%s6520_s5 + $0xe8] sm:$0xff]  ;;  %v4436_v63 = vld [vmem:[%s6518_s3 + $0x100] sm:$0xff] }
0x1167   : > { %v4923_v1 = vpop.f32.mrf.mxu0  ;;  %4929 = vmatpush3.xpose.msk.msra.mxu1 %vm520_vm2, %v4401_v2 }
0x1168   : > { %v5975_v3 = vadd.f32 %v2603_v62, %v2599_v0  ;;  %4930 = vmatprep.subr.mxu1 %v5308_v16  ;;  %v4437_v62 = vld [vmem:[%s6518_s3 + $0x108] sm:$0xff]  ;;  %v4435_v0 = vld [vmem:[%s6518_s3 + $0xf8] sm:$0xff]  ;;  %v4434_v1 = vld [vmem:[%s6518_s3 + $0xf0] sm:$0xff] }
0x116a   : > { %v2605_v5 = vsel %vm483_vm1, %v5975_v3, 0.0 }
0x116b   : > { %2606 = vadd.xlane.f32.xlu1 %v2605_v5  ;;  %4931 = vmatpush3.xpose.msk.msra.mxu1 %vm520_vm2, %v4400_v6  ;;  %v4433_v6 = vld [vmem:[%s6518_s3 + $0xe8] sm:$0xff] }
0x116c   : > { %4932 = vmatprep.subr.mxu1 %v5308_v16 }
0x116f   : > { %4933 = vmatpush3.xpose.msk.msra.mxu1 %vm520_vm2, %v4399_v7  ;;  %v4432_v7 = vld [vmem:[%s6518_s3 + $0xe0] sm:$0xff] }
0x1170   : > { %4934 = vmatprep.subr.mxu1 %v5308_v16 }
0x1173   : > { %4935 = vmatpush3.xpose.msk.msra.mxu1 %vm520_vm2, %v4398_v8  ;;  %v4431_v8 = vld [vmem:[%s6518_s3 + $0xd8] sm:$0xff] }
0x1174   : > { %4936 = vmatprep.subr.mxu1 %v5308_v16 }
0x1177   : > { %4937 = vmatpush3.xpose.msk.msra.mxu1 %vm520_vm2, %v4397_v9  ;;  %v4430_v9 = vld [vmem:[%s6518_s3 + $0xd0] sm:$0xff] }
0x1178   : > { %4938 = vmatprep.subr.mxu1 %v5308_v16 }
0x117b   : > { %4939 = vmatpush3.xpose.msk.msra.mxu1 %vm520_vm2, %v4396_v10  ;;  %v4429_v10 = vld [vmem:[%s6518_s3 + $0xc8] sm:$0xff] }
0x117c   : > { %4940 = vmatprep.subr.mxu1 %v5308_v16 }
0x117f   : > { %4941 = vmatpush3.xpose.msk.msra.mxu1 %vm520_vm2, %v4395_v11  ;;  %v4428_v11 = vld [vmem:[%s6518_s3 + $0xc0] sm:$0xff] }
0x1180   : > { %4942 = vmatprep.subr.mxu1 %v5308_v16 }
0x1183   : > { %4943 = vmatpush3.xpose.msk.msra.mxu1 %vm520_vm2, %v4394_v13 }
0x1184   : > { %4944 = vmatprep.subr.mxu1 %v5308_v16 }
0x1187   : > { %4945 = vmatpush3.xpose.msk.msra.mxu1 %vm520_vm2, %v4393_v19 }
0x1188   : > { %4946 = vmatprep.subr.mxu1 %v5308_v16 }
0x118b   : > { %4947 = vmatpush3.xpose.msk.msra.mxu1 %vm520_vm2, %v4392_v20 }
0x118c   : > { %4948 = vmatprep.subr.mxu1 %v5308_v16 }
0x118f   : > { %4949 = vmatpush3.xpose.msk.msra.mxu1 %vm520_vm2, %v4391_v21 }
0x1190   : > { %4950 = vmatprep.subr.mxu1 %v5308_v16 }
0x1193   : > { %4951 = vmatpush3.xpose.msk.msra.mxu1 %vm520_vm2, %v4390_v22 }
0x1194   : > { %4952 = vmatprep.subr.mxu1 %v5308_v16 }
0x1197   : > { %4953 = vmatpush3.xpose.msk.msra.mxu1 %vm520_vm2, %v4389_v23 }
0x1198   : > { %4954 = vmatprep.subr.mxu1 %v5308_v16 }
0x119b   : > { %4955 = vmatpush3.xpose.msk.msra.mxu1 %vm520_vm2, %v4388_v25 }
0x119c   : > { %4997 = vmatprep.subr.mxu1 %v5308_v16 }
0x11f4   : > { %v2607_v12 = vpop.xlane.xlu1 %2606 }
0x11f5   : > { %v2608_v14 = vmul.f32 0.03125, %v2607_v12 }
0x11f7   : > { %v2609_v15 = vsub.f32 %v5975_v3, %v2608_v14 }
0x11f9   : > { %v2610_v17 = vmul.f32 %v2609_v15, %v2609_v15 }
0x11fb   : > { %v2611_v18 = vsel %vm483_vm1, %v2610_v17, 0.0 }
0x11fc   : > { %2612 = vadd.xlane.f32.xlu0 %v2611_v18 }
0x1285   : > { %v2613_v26 = vpop.xlane.xlu0 %2612 }
0x1286   : > { %v2614_v27 = vmul.f32 0.03125, %v2613_v26 }
0x1288   : > { %v2615_v28 = vadd.f32 1e-05, %v2614_v27 }
0x128a   : > { %5218 = vrsqrt.f32 %v2615_v28 }
0x1297   : > { %v5219_v30 = vpop.eup %5218 }
0x1298   : > { %v2617_v31 = vmul.f32 %v5219_v30, %v2609_v15  ;;  %v6161_v15 = vld [vmem:[%s6522_s7 + $0x10] sm:$0xff] }
0x1299   : > { %v2878_v17 = vrot.slane %v6161_v15, %v5539_v38  ;;  %v2883_v20 = vrot.slane %v6161_v15, %v5547_v40 }
0x129a   : > { %v2622_v33 = vmul.f32 %v2621_v29, %v2617_v31 }
0x129c   : > { %v2627_v34 = vadd.f32 %v2626_v32, %v2622_v33 }
0x129e   : > { %4957 = vmatmul.mubr.msk.f32.vlgmr.msra.gmra.mxu1 %vm520_vm2, %v2627_v34 }
0x129f   : > { %4999 = vmatprep.mubr.msk.f32.mxu1 %vm5309_vm3, %v5308_v16 }
0x135e   : > { %v2768_v46 = vpop.f32.mrf.mxu1 }
0x135f   : > { %v2769_v47 = vadd.f32 %v4404_v45, %v2768_v46 }
0x1360   : > { %v4958_v48 = vpop.f32.mrf.mxu1 }
0x1361   : > { %v2773_v49 = vmul.f32 0.70710677, %v2769_v47  ;;  %v2772_v51 = vmul.f32 0.5, %v2769_v47 }
0x1363   : > { %5220 = verf.f32 %v2773_v49 }
0x1370   : > { %v5221_v50 = vpop.eup %5220 }
0x1371   : > { %v2775_v52 = vadd.f32 1.0, %v5221_v50 }
0x1373   : > { %v2776_v53 = vmul.f32 %v2775_v52, %v2772_v51 }
0x1375   : > { %4968 = vmatmul.mubr.f32.vlgmr.msra.gmra.mxu0 %v2776_v53 }
0x1376   : > { %4994 = vmatprep.mubr.msk.f32.mxu0 %vm5309_vm3, %v5308_v16  ;;  %4971 = vmatpush3.xpose.msk.msra.mxu0 %vm520_vm2, %v4439_v60 }
0x1377   : > { %4972 = vmatprep.subr.mxu0 %v5308_v16 }
0x137a   : > { %4973 = vmatpush3.xpose.msk.msra.mxu0 %vm520_vm2, %v4438_v24 }
0x137b   : > { %4974 = vmatprep.subr.mxu0 %v5308_v16 }
0x137e   : > { %4975 = vmatpush3.xpose.msk.msra.mxu0 %vm520_vm2, %v4437_v62 }
0x137f   : > { %4976 = vmatprep.subr.mxu0 %v5308_v16 }
0x1382   : > { %4977 = vmatpush3.xpose.msk.msra.mxu0 %vm520_vm2, %v4436_v63 }
0x1383   : > { %4978 = vmatprep.subr.mxu0 %v5308_v16 }
0x1386   : > { %4979 = vmatpush3.xpose.msk.msra.mxu0 %vm520_vm2, %v4435_v0 }
0x1387   : > { %4980 = vmatprep.subr.mxu0 %v5308_v16 }
0x138a   : > { %4981 = vmatpush3.xpose.msk.msra.mxu0 %vm520_vm2, %v4434_v1 }
0x138b   : > { %4982 = vmatprep.subr.mxu0 %v5308_v16 }
0x138e   : > { %4983 = vmatpush3.xpose.msk.msra.mxu0 %vm520_vm2, %v4433_v6 }
0x138f   : > { %4984 = vmatprep.subr.mxu0 %v5308_v16 }
0x1392   : > { %4985 = vmatpush3.xpose.msk.msra.mxu0 %vm520_vm2, %v4432_v7 }
0x1393   : > { %4986 = vmatprep.subr.mxu0 %v5308_v16 }
0x1396   : > { %4987 = vmatpush3.xpose.msk.msra.mxu0 %vm520_vm2, %v4431_v8 }
0x1397   : > { %4988 = vmatprep.subr.mxu0 %v5308_v16 }
0x139a   : > { %4989 = vmatpush3.xpose.msk.msra.mxu0 %vm520_vm2, %v4430_v9 }
0x139b   : > { %4990 = vmatprep.subr.mxu0 %v5308_v16 }
0x139e   : > { %4991 = vmatpush3.xpose.msk.msra.mxu0 %vm520_vm2, %v4429_v10 }
0x139f   : > { %4992 = vmatprep.subr.mxu0 %v5308_v16 }
0x13a2   : > { %4993 = vmatpush3.xpose.msk.msra.mxu0 %vm520_vm2, %v4428_v11 }
0x13a3   : > { %5017 = vmatprep.subr.mxu0 %v5308_v16 }
0x1435   : > { %v2848_v55 = vpop.f32.mrf.mxu0 }
0x1436   : > { %v2852_v56 = vadd.f32 %v2848_v55, %v5975_v3 }
0x1437   : > { %v4969_v57 = vpop.f32.mrf.mxu0 }
0x1438   : > { %v6092_v58 = vadd.f32 %v2856_v54, %v2852_v56 }
0x143a   : > { %v2862_v59 = vsel %vm483_vm1, %v6092_v58, 0.0 }
0x143b   : > { %2863 = vadd.xlane.f32.xlu0 %v2862_v59 }
0x14c4   : > { %v2864_v3 = vpop.xlane.xlu0 %2863 }
0x14c5   : > { %v2865_v5 = vmul.f32 0.03125, %v2864_v3 }
0x14c7   : > { %v2866_v37 = vsub.f32 %v6092_v58, %v2865_v5 }
0x14c9   : > { %v2867_v39 = vmul.f32 %v2866_v37, %v2866_v37 }
0x14cb   : > { %v2868_v2 = vsel %vm483_vm1, %v2867_v39, 0.0 }
0x14cc   : > { %2869 = vadd.xlane.f32.xlu1 %v2868_v2 }
0x1555   : > { %v2870_v13 = vpop.xlane.xlu1 %2869 }
0x1556   : > { %v2871_v12 = vmul.f32 0.03125, %v2870_v13 }
0x1558   : > { %v2872_v14 = vadd.f32 1e-05, %v2871_v12 }
0x155a   : > { %5222 = vrsqrt.f32 %v2872_v14 }
0x1567   : > { %v5223_v18 = vpop.eup %5222 }
0x1568   : > { %v2874_v19 = vmul.f32 %v5223_v18, %v2866_v37 }
0x156a   : > { %v2879_v21 = vmul.f32 %v2878_v17, %v2874_v19 }
0x156c   : > { %v2884_v22 = vadd.f32 %v2883_v20, %v2879_v21 }
0x156e   : > { %4995 = vmatmul.mubr.msk.f32.vlgmr.msra.gmra.mxu0 %vm520_vm2, %v2884_v22 }
0x156f   : > { %5019 = vmatprep.mubr.msk.f32.mxu0 %vm5309_vm3, %v5308_v16 }
0x162e   : > { %v3003_v23 = vpop.f32.mrf.mxu0 }
0x162f   : > { %3011 = vrot.lane.b32.xlu1 %v3003_v23, %s6547_s25  ;;  %3008 = vrot.lane.b32.xlu0 %v3003_v23, %s6548_s15  ;;  %v3017_v28 = vmul.f32 0.35355338, %v3003_v23  ;;  %s5318_s15 = smov [#allocation2]  }
0x1630   : > { %v4996_v25 = vpop.f32.mrf.mxu0 }
0x1633   : > { %3014 = vrot.lane.b32.xlu1 %v3003_v23, %s6549_s24  ;;  %3021 = vrot.lane.b32.xlu0 %v3003_v23, %s6550_s22 }
0x16a1   : > { %v6174_v38 = vpop.permute.xlu1 %3011  ;;  %v6176_v40 = vpop.permute.xlu0 %3008 }
0x16a2   : > { %3175 = vrot.lane.b32.xlu0 %v6174_v38, %s6550_s22  ;;  %3098 = vrot.lane.b32.xlu1 %v6176_v40, %s6550_s22  ;;  %v3018_v30 = vmul.f32 0.35355338, %v6176_v40  ;;  %v3019_v32 = vmul.f32 0.35355338, %v6174_v38 }
0x16a5   : > { %v6182_v26 = vpop.permute.xlu1 %3014  ;;  %v3022_v27 = vpop.permute.xlu0 %3021 }
0x16a6   : > { %3252 = vrot.lane.b32.xlu1 %v6182_v26, %s6550_s22  ;;  %4998 = vmatpush3.xpose.msk.msra.mxu1 %vm646_vm4, %v3022_v27  ;;  %v3020_v34 = vmul.f32 0.35355338, %v6182_v26  ;;  %v4471_v27 = vld [vmem:[%s6519_s4 + $0x50] sm:$0xff]  ;;  %s377_s22 = sand.u32 1, %s5298_s18  }
0x16a7   : > { %5002 = vmatprep.subr.mxu1 %v5308_v16  ;;  %s4206_s16 = scalar_lea.sflag [#allocation3], %s377_s22 }
0x16a9   : > { %5000 = vmatmul.mubr.msk.f32.vlgmr.msra.gmra.mxu1 %vm646_vm4, %v3017_v28 }
0x16aa   : > { %5004 = vmatprep.mubr.msk.f32.mxu1 %vm5309_vm3, %v5308_v16 }
0x1714   : > { %v3099_v29 = vpop.permute.xlu1 %3098  ;;  %v3176_v31 = vpop.permute.xlu0 %3175 }
0x1715   : > { %5003 = vmatpush3.xpose.msk.msra.mxu1 %vm646_vm4, %v3099_v29 }
0x1716   : > { %5007 = vmatprep.subr.mxu1 %v5308_v16 }
0x1718   : > { %5005 = vmatmul.mubr.msk.f32.vlgmr.msra.gmra.mxu1 %vm646_vm4, %v3018_v30  ;;  %v3253_v33 = vpop.permute.xlu1 %3252  ;;  %v4470_v30 = vld [vmem:[%s6519_s4 + $0x48] sm:$0xff] }
0x1719   : > { %5008 = vmatpush3.xpose.msk.msra.mxu1 %vm646_vm4, %v3176_v31  ;;  %5009 = vmatprep.mubr.msk.f32.mxu1 %vm5309_vm3, %v5308_v16  ;;  %v4469_v31 = vld [vmem:[%s6519_s4 + $0x40] sm:$0xff] }
0x171a   : > { %5012 = vmatprep.subr.mxu1 %v5308_v16 }
0x171c   : > { %5010 = vmatmul.mubr.msk.f32.vlgmr.msra.gmra.mxu1 %vm646_vm4, %v3019_v32 }
0x171d   : > { %5013 = vmatpush3.xpose.msk.msra.mxu1 %vm646_vm4, %v3253_v33  ;;  %5014 = vmatprep.mubr.msk.f32.mxu1 %vm5309_vm3, %v5308_v16 }
0x171e   : > { %5022 = vmatprep.subr.mxu1 %v5308_v16 }
0x1720   : > { %5015 = vmatmul.mubr.msk.f32.vlgmr.msra.gmra.mxu1 %vm646_vm4, %v3020_v34 }
0x1721   : > { %5024 = vmatprep.mubr.msk.f32.mxu1 %vm5309_vm3, %v5308_v16 }
0x1769   : > { %v3094_v35 = vpop.f32.mrf.mxu1 }
0x176a   : > { %v3329_v42 = vsel %vm953_vm5, %v3094_v35, -inf }
0x176b   : > { %3330 = vmax.xlane.f32.xlu0 %v3329_v42  ;;  %v5001_v43 = vpop.f32.mrf.mxu1 }
0x17d8   : > { %v3171_v44 = vpop.f32.mrf.mxu1 }
0x17d9   : > { %v3332_v45 = vsel %vm953_vm5, %v3171_v44, -inf }
0x17da   : > { %3333 = vmax.xlane.f32.xlu1 %v3332_v45  ;;  %v5006_v46 = vpop.f32.mrf.mxu1 }
0x17dc   : > { %v3248_v47 = vpop.f32.mrf.mxu1 }
0x17dd   : > { %v3335_v48 = vsel %vm953_vm5, %v3248_v47, -inf }
0x17de   : > { %3336 = vmax.xlane.f32.xlu0 %v3335_v48  ;;  %v5011_v49 = vpop.f32.mrf.mxu1 }
0x17e0   : > { %v3325_v50 = vpop.f32.mrf.mxu1 }
0x17e1   : > { %v3338_v51 = vsel %vm953_vm5, %v3325_v50, -inf }
0x17e2   : > { %3339 = vmax.xlane.f32.xlu0 %v3338_v51  ;;  %v5016_v52 = vpop.f32.mrf.mxu1 }
0x17eb   : > { %3373 = vrot.lane.b32.xlu1 %v3003_v23, %s6543_s30 }
0x17f4   : > { %v3331_v53 = vpop.xlane.xlu0 %3330 }
0x17f5   : > { %v3341_v54 = vsub.f32 %v3094_v35, %v3331_v53 }
0x17f7   : > { %v3345_v55 = vmul.f32 1.442695, %v3341_v54 }
0x17f9   : > { %5224 = vpow2.f32 %v3345_v55 }
0x1806   : > { %v5225_v56 = vpop.eup %5224 }
0x1807   : > { %v3353_v57 = vsel %vm953_vm5, %v5225_v56, 0.0 }
0x180f   : > { %3354 = vadd.xlane.f32.xlu1 %v3353_v57  ;;  %v4490_v57 = vld [vmem:[%s6520_s5 + $0x160] sm:$0xff] }
0x1863   : > { %v3334_v59 = vpop.xlane.xlu1 %3333 }
0x1864   : > { %v3342_v60 = vsub.f32 %v3171_v44, %v3334_v59  ;;  %v4489_v59 = vld [vmem:[%s6520_s5 + $0x158] sm:$0xff] }
0x1866   : > { %v3347_v24 = vmul.f32 1.442695, %v3342_v60  ;;  %v4488_v60 = vld [vmem:[%s6520_s5 + $0x150] sm:$0xff] }
0x1867   : > { %v3374_v62 = vpop.permute.xlu1 %3373  ;;  %v3337_v63 = vpop.xlane.xlu0 %3336 }
0x1868   : > { %5226 = vpow2.f32 %v3347_v24  ;;  %v3343_v0 = vsub.f32 %v3248_v47, %v3337_v63  ;;  %5018 = vmatpush3.msk.msra.mxu0 %vm1004_vm6, %v3374_v62  ;;  %v4487_v24 = vld [vmem:[%s6520_s5 + $0x148] sm:$0xff]  ;;  %v4486_v62 = vld [vmem:[%s6520_s5 + $0x140] sm:$0xff]  ;;  %v4485_v63 = vld [vmem:[%s6520_s5 + $0x138] sm:$0xff] }
0x1869   : > { %5027 = vmatprep.subr.mxu0 %v5308_v16 }
0x186a   : > { %v3349_v1 = vmul.f32 1.442695, %v3343_v0  ;;  %v4484_v0 = vld [vmem:[%s6520_s5 + $0x130] sm:$0xff] }
0x186b   : > { %v3340_v3 = vpop.xlane.xlu0 %3339 }
0x186c   : > { %5228 = vpow2.f32 %v3349_v1  ;;  %v3344_v5 = vsub.f32 %v3325_v50, %v3340_v3  ;;  %v3790_v50 = vrot.slane %v6161_v15, %v5660_v4  ;;  %v4492_v4 = vld [vmem:[%s6520_s5 + $0x170] sm:$0xff] }
0x186e   : > { %v3351_v37 = vmul.f32 1.442695, %v3344_v5 }
0x1870   : > { %5230 = vpow2.f32 %v3351_v37 }
0x1875   : > { %v5227_v39 = vpop.eup %5226 }
0x1876   : > { %v3356_v2 = vsel %vm953_vm5, %v5227_v39, 0.0 }
0x1877   : > { %3357 = vadd.xlane.f32.xlu0 %v3356_v2  ;;  %v4483_v2 = vld [vmem:[%s6520_s5 + $0x128] sm:$0xff] }
0x1879   : > { %v5229_v6 = vpop.eup %5228 }
0x187a   : > { %v3359_v7 = vsel %vm953_vm5, %v5229_v6, 0.0 }
0x187b   : > { %3360 = vadd.xlane.f32.xlu1 %v3359_v7  ;;  %v4481_v7 = vld [vmem:[%s6520_s5 + $0x118] sm:$0xff] }
0x187d   : > { %v5231_v8 = vpop.eup %5230 }
0x187e   : > { %v3362_v9 = vsel %vm953_vm5, %v5231_v8, 0.0 }
0x187f   : > { %3363 = vadd.xlane.f32.xlu0 %v3362_v9  ;;  %v4479_v9 = vld [vmem:[%s6520_s5 + $0x108] sm:$0xff] }
0x188c   : > { %3527 = vrot.lane.b32.xlu1 %v6174_v38, %s6543_s30 }
0x1890   : > { %3604 = vrot.lane.b32.xlu1 %v6182_v26, %s6543_s30  ;;  %v4472_v26 = vld [vmem:[%s6519_s4 + $0x58] sm:$0xff] }
0x1895   : > { %3450 = vrot.lane.b32.xlu0 %v6176_v40, %s6543_s30 }
0x1898   : > { %v3355_v10 = vpop.xlane.xlu1 %3354 }
0x1899   : > { %5232 = vrcp.f32 %v3355_v10  ;;  %v4478_v10 = vld [vmem:[%s6520_s5 + $0x100] sm:$0xff] }
0x18a6   : > { %v5233_v11 = vpop.eup %5232 }
0x18a7   : > { %v3369_v13 = vmul.f32 %v5233_v11, %v5225_v56  ;;  %v4493_v56 = vld [vmem:[%s6520_s5 + $0x178] sm:$0xff] }
0x18a9   : > { %5020 = vmatmul.mubr.msk.f32.vlgmr.msra.gmra.mxu0 %vm1000_vm7, %v3369_v13 }
0x18aa   : > { %5029 = vmatprep.mubr.msk.f32.mxu0 %vm5309_vm3, %v5308_v16 }
0x1900   : > { %v3358_v12 = vpop.xlane.xlu0 %3357 }
0x1901   : > { %5234 = vrcp.f32 %v3358_v12 }
0x1904   : > { %v3361_v14 = vpop.xlane.xlu1 %3360 }
0x1905   : > { %5236 = vrcp.f32 %v3361_v14  ;;  %v3808_v14 = vrot.slane %v6161_v15, %v5752_v36  ;;  %v4514_v36 = vld [vmem:[%s6521_s6 + $0x50] sm:$0xff] }
0x1908   : > { %v3528_v17 = vpop.permute.xlu1 %3527  ;;  %v3364_v18 = vpop.xlane.xlu0 %3363 }
0x1909   : > { %5238 = vrcp.f32 %v3364_v18  ;;  %5028 = vmatpush3.msk.msra.mxu0 %vm1004_vm6, %v3528_v17 }
0x190a   : > { %5037 = vmatprep.subr.mxu0 %v5308_v16 }
0x190c   : > { %v3451_v19 = vpop.permute.xlu0 %3450  ;;  %v3605_v22 = vpop.permute.xlu1 %3604 }
0x190d   : > { %5023 = vmatpush3.msk.msra.mxu1 %vm1004_vm6, %v3451_v19  ;;  %v3813_v19 = vrot.slane %v6161_v15, %v5755_v41  ;;  %v4513_v41 = vld [vmem:[%s6521_s6 + $0x48] sm:$0xff] }
0x190e   : > { %v5235_v20 = vpop.eup %5234  ;;  %5032 = vmatprep.subr.mxu1 %v5308_v16 }
0x190f   : > { %v3370_v21 = vmul.f32 %v5235_v20, %v5227_v39 }
0x1911   : > { %5025 = vmatmul.mubr.msk.f32.vlgmr.msra.gmra.mxu1 %vm1000_vm7, %v3370_v21 }
0x1912   : > { %v5237_v23 = vpop.eup %5236  ;;  %5033 = vmatpush3.msk.msra.mxu1 %vm1004_vm6, %v3605_v22  ;;  %5034 = vmatprep.mubr.msk.f32.mxu1 %vm5309_vm3, %v5308_v16  ;;  %v4515_v22 = vld [vmem:[%s6521_s6 + $0x58] sm:$0xff] }
0x1913   : > { %v3371_v25 = vmul.f32 %v5237_v23, %v5229_v6  ;;  %5048 = vmatprep.subr.mxu1 %v5308_v16  ;;  %v4482_v6 = vld [vmem:[%s6520_s5 + $0x120] sm:$0xff] }
0x1914   : > { %v4512_v23 = vld [vmem:[%s6521_s6 + $0x40] sm:$0xff] }
0x1915   : > { %5030 = vmatmul.mubr.msk.f32.vlgmr.msra.gmra.mxu0 %vm1000_vm7, %v3371_v25  ;;  %v4494_v25 = vld [vmem:[%s6523_s8 + $0x2] ss:$0 sm:$0xff] }
0x1916   : > { %v5239_v38 = vpop.eup %5238  ;;  %5045 = vmatprep.mubr.msk.f32.mxu0 %vm5309_vm3, %v5308_v16  ;;  %5038 = vmatpush3.xpose.msk.msra.mxu0 %vm520_vm2, %v4472_v26 }
0x1917   : > { %v3372_v40 = vmul.f32 %v5239_v38, %v5231_v8  ;;  %5039 = vmatprep.subr.mxu0 %v5308_v16  ;;  %v4480_v8 = vld [vmem:[%s6520_s5 + $0x110] sm:$0xff] }
0x1919   : > { %5035 = vmatmul.mubr.msk.f32.vlgmr.msra.gmra.mxu1 %vm1000_vm7, %v3372_v40 }
0x191a   : > { %5080 = vmatprep.mubr.msk.f32.mxu1 %vm5309_vm3, %v5308_v16  ;;  %5040 = vmatpush3.xpose.msk.msra.mxu0 %vm520_vm2, %v4471_v27 }
0x191b   : > { %5041 = vmatprep.subr.mxu0 %v5308_v16  ;;  %5049 = vmatpush3.xpose.msk.msra.mxu1 %vm520_vm2, %v4493_v56 }
0x191c   : > { %5050 = vmatprep.subr.mxu1 %v5308_v16 }
0x191e   : > { %5042 = vmatpush3.xpose.msk.msra.mxu0 %vm520_vm2, %v4470_v30 }
0x191f   : > { %5043 = vmatprep.subr.mxu0 %v5308_v16  ;;  %5051 = vmatpush3.xpose.msk.msra.mxu1 %vm520_vm2, %v4492_v4  ;;  %v4070_v4 = vld [vmem:[%s6525_s10 + $0x28] sm:$0xff] }
0x1920   : > { %5052 = vmatprep.subr.mxu1 %v5308_v16 }
0x1922   : > { %5044 = vmatpush3.xpose.msk.msra.mxu0 %vm520_vm2, %v4469_v31 }
0x1923   : > { %5083 = vmatprep.subr.mxu0 %v5308_v16 }
0x1969   : > { %v3446_v28 = vpop.f32.mrf.mxu0 }
0x196b   : > { %v5021_v29 = vpop.f32.mrf.mxu0 }
0x19d1   : > { %v3523_v32 = vpop.f32.mrf.mxu1 }
0x19d2   : > { %3682 = vrot.lane.b32.xlu0 %v3523_v32, %s6544_s12  ;;  %v4043_v32 = vrot.slane %v6161_v15, %v5786_v61  ;;  %v4079_v61 = vld [vmem:[%s6525_s10 + $0x70] sm:$0xff]  ;;  %v4078_v15 = vld [vmem:[%s6525_s10 + $0x68] sm:$0xff]  ;;  %s4533_s12 = sshll.u32 %s5400_s21, 4  ;;  %s5250_s21 = sshll.u32 %s5318_s15, 4  ;;  %s5251_s21 = int_to_ptr.vmem [resolvable:$false] %s5250_s21 }
0x19d3   : > { %v5026_v33 = vpop.f32.mrf.mxu1  ;;  %s6480_s26 = scalar_lea.hbm %s6526_s11, %s4533_s12  ;;  %s5252_s24 = scalar_lea.vmem %s5251_s21, 32 }
0x19d5   : > { %v3600_v34 = vpop.f32.mrf.mxu0 }
0x19d6   : > { %3686 = vrot.lane.b32.xlu1 %v3600_v34, %s6545_s14  ;;  %s378_s14 = scalar_lea.vmem [#allocation2], %s377_s22 }
0x19d7   : > { %v5031_v35 = vpop.f32.mrf.mxu0 }
0x19d9   : > { %v3677_v42 = vpop.f32.mrf.mxu1 }
0x19da   : > { %3690 = vrot.lane.b32.xlu0 %v3677_v42, %s6546_s29  ;;  %s4218_s29 = sshll.u32 %s378_s14, 4  ;;  %s4219_s29 = int_to_ptr.vmem [resolvable:$true] %s4218_s29 }
0x19db   : > { %v5036_v43 = vpop.f32.mrf.mxu1  ;;  %s5246_s25 = scalar_lea.vmem %s4219_s29, 16  ;;  %p5253_p0 = scmp.lt.s32.totalorder %s4219_s29, %s5251_s21 }
0x19dc   : > { %p5247_p11 = scmp.ne.s32.totalorder %s4219_s29, %s5246_s25  ;;  %p5254_p1 = scmp.lt.s32.totalorder %s5252_s24, %s5246_s25 }
0x19de   : > { %p5248_p12 = pnand %p5247_p11, %p5417_p5  ;;  %p5255_p2 = por %p5254_p1, %p5253_p0 }
0x19e0   : > { %p5249_p13 = pneg %p5248_p12 }
0x19e2   : > { %p5256_p3 = pnand %p5255_p2, %p5249_p13 }
0x1a44   : > { %v3683_v44 = vpop.permute.xlu0 %3682 }
0x1a45   : > { %v3693_v46 = vsel %vm646_vm4, %v3446_v28, %v3683_v44  ;;  %v4080_v44 = vld [vmem:[%s6525_s10 + $0x78] sm:$0xff] }
0x1a48   : > { %v3687_v45 = vpop.permute.xlu1 %3686 }
0x1a49   : > { %v3694_v47 = vsel %vm1321_vm8, %v3693_v46, %v3687_v45  ;;  %v4077_v45 = vld [vmem:[%s6525_s10 + $0x60] sm:$0xff]  ;;  %v4076_v46 = vld [vmem:[%s6525_s10 + $0x58] sm:$0xff] }
0x1a4c   : > { %v3691_v48 = vpop.permute.xlu0 %3690 }
0x1a4d   : > { %v3695_v49 = vsel %vm1323_vm9, %v3694_v47, %v3691_v48  ;;  %v4075_v47 = vld [vmem:[%s6525_s10 + $0x50] sm:$0xff]  ;;  %v4074_v48 = vld [vmem:[%s6525_s10 + $0x48] sm:$0xff] }
0x1a4e   : > { %5046 = vmatmul.mubr.msk.f32.vlgmr.msra.gmra.mxu0 %vm520_vm2, %v3695_v49  ;;  %v4073_v49 = vld [vmem:[%s6525_s10 + $0x40] sm:$0xff] }
0x1a4f   : > { %5091 = vmatprep.mubr.msk.f32.mxu0 %vm5309_vm3, %v5308_v16  ;;  %5084 = vmatpush3.xpose.msra.mxu0 %v4515_v22 }
0x1a50   : > { %5085 = vmatprep.subr.mxu0 %v5308_v16 }
0x1a53   : > { %5086 = vmatpush3.xpose.msra.mxu0 %v4514_v36 }
0x1a54   : > { %5087 = vmatprep.subr.mxu0 %v5308_v16 }
0x1a57   : > { %5088 = vmatpush3.xpose.msra.mxu0 %v4513_v41 }
0x1a58   : > { %5089 = vmatprep.subr.mxu0 %v5308_v16 }
0x1a5b   : > { %5090 = vmatpush3.xpose.msra.mxu0 %v4512_v23 }
0x1a5c   : > { %5094 = vmatprep.subr.mxu0 %v5308_v16 }
0x1b0e   : > { %v3782_v51 = vpop.f32.mrf.mxu0 }
0x1b0f   : > { %v3786_v52 = vadd.f32 %v3782_v51, %v6092_v58  ;;  %v4491_v58 = vld [vmem:[%s6520_s5 + $0x168] sm:$0xff]  ;;  %v4071_v51 = vld [vmem:[%s6525_s10 + $0x30] sm:$0xff] }
0x1b10   : > { %v5047_v53 = vpop.f32.mrf.mxu0  ;;  %5053 = vmatpush3.xpose.msk.msra.mxu1 %vm520_vm2, %v4491_v58  ;;  %v4069_v58 = vld [vmem:[%s6525_s10 + $0x20] sm:$0xff] }
0x1b11   : > { %v6276_v54 = vadd.f32 %v3790_v50, %v3786_v52  ;;  %5054 = vmatprep.subr.mxu1 %v5308_v16  ;;  %v4072_v50 = vld [vmem:[%s6525_s10 + $0x38] sm:$0xff] }
0x1b13   : > { %v3792_v55 = vsel %vm483_vm1, %v6276_v54, 0.0 }
0x1b14   : > { %3793 = vadd.xlane.f32.xlu1 %v3792_v55  ;;  %5055 = vmatpush3.xpose.msk.msra.mxu1 %vm520_vm2, %v4490_v57  ;;  %v4068_v57 = vld [vmem:[%s6525_s10 + $0x18] sm:$0xff] }
0x1b15   : > { %5056 = vmatprep.subr.mxu1 %v5308_v16 }
0x1b18   : > { %5057 = vmatpush3.xpose.msk.msra.mxu1 %vm520_vm2, %v4489_v59  ;;  %v4067_v59 = vld [vmem:[%s6525_s10 + $0x10] sm:$0xff] }
0x1b19   : > { %5058 = vmatprep.subr.mxu1 %v5308_v16 }
0x1b1c   : > { %5059 = vmatpush3.xpose.msk.msra.mxu1 %vm520_vm2, %v4488_v60  ;;  %v4066_v60 = vld [vmem:[%s6525_s10 + $0x8] sm:$0xff] }
0x1b1d   : > { %5060 = vmatprep.subr.mxu1 %v5308_v16 }
0x1b20   : > { %5061 = vmatpush3.xpose.msk.msra.mxu1 %vm520_vm2, %v4487_v24  ;;  %v4065_v24 = vld [vmem:[%s6525_s10] sm:$0xff] }
0x1b21   : > { %5062 = vmatprep.subr.mxu1 %v5308_v16 }
0x1b24   : > { %5063 = vmatpush3.xpose.msk.msra.mxu1 %vm520_vm2, %v4486_v62 }
0x1b25   : > { %5064 = vmatprep.subr.mxu1 %v5308_v16 }
0x1b28   : > { %5065 = vmatpush3.xpose.msk.msra.mxu1 %vm520_vm2, %v4485_v63 }
0x1b29   : > { %5066 = vmatprep.subr.mxu1 %v5308_v16 }
0x1b2c   : > { %5067 = vmatpush3.xpose.msk.msra.mxu1 %vm520_vm2, %v4484_v0 }
0x1b2d   : > { %5068 = vmatprep.subr.mxu1 %v5308_v16 }
0x1b30   : > { %5069 = vmatpush3.xpose.msk.msra.mxu1 %vm520_vm2, %v4483_v2 }
0x1b31   : > { %5070 = vmatprep.subr.mxu1 %v5308_v16 }
0x1b34   : > { %5071 = vmatpush3.xpose.msk.msra.mxu1 %vm520_vm2, %v4482_v6 }
0x1b35   : > { %5072 = vmatprep.subr.mxu1 %v5308_v16 }
0x1b38   : > { %5073 = vmatpush3.xpose.msk.msra.mxu1 %vm520_vm2, %v4481_v7 }
0x1b39   : > { %5074 = vmatprep.subr.mxu1 %v5308_v16 }
0x1b3c   : > { %5075 = vmatpush3.xpose.msk.msra.mxu1 %vm520_vm2, %v4480_v8 }
0x1b3d   : > { %5076 = vmatprep.subr.mxu1 %v5308_v16 }
0x1b40   : > { %5077 = vmatpush3.xpose.msk.msra.mxu1 %vm520_vm2, %v4479_v9 }
0x1b41   : > { %5078 = vmatprep.subr.mxu1 %v5308_v16 }
0x1b44   : > { %5079 = vmatpush3.xpose.msk.msra.mxu1 %vm520_vm2, %v4478_v10 }
0x1b9d   : > { %v3794_v1 = vpop.xlane.xlu1 %3793 }
0x1b9e   : > { %v3795_v3 = vmul.f32 0.03125, %v3794_v1  ;;  %v4045_v1 = vld [vmem:[%s6524_s9] sm:$0xff] }
0x1b9f   : > { %v4081_v2 = vrot.slane %v4045_v1, 2 }
0x1ba0   : > { %v3796_v5 = vsub.f32 %v6276_v54, %v3795_v3 }
0x1ba2   : > { %v3797_v37 = vmul.f32 %v3796_v5, %v3796_v5 }
0x1ba4   : > { %v3798_v39 = vsel %vm483_vm1, %v3797_v37, 0.0  ;;  %v4062_v37 = vrot.slane %v4045_v1, 1 }
0x1ba5   : > { %3799 = vadd.xlane.f32.xlu0 %v3798_v39 }
0x1c2e   : > { %v3800_v11 = vpop.xlane.xlu0 %3799 }
0x1c2f   : > { %v3801_v13 = vmul.f32 0.03125, %v3800_v11 }
0x1c31   : > { %v3802_v12 = vadd.f32 1e-05, %v3801_v13 }
0x1c33   : > { %5240 = vrsqrt.f32 %v3802_v12 }
0x1c40   : > { %v5241_v17 = vpop.eup %5240 }
0x1c41   : > { %v3804_v18 = vmul.f32 %v5241_v17, %v3796_v5 }
0x1c43   : > { %v3809_v20 = vmul.f32 %v3808_v14, %v3804_v18 }
0x1c45   : > { %v3814_v21 = vadd.f32 %v3813_v19, %v3809_v20 }
0x1c47   : > { %5081 = vmatmul.mubr.msk.f32.vlgmr.msra.gmra.mxu1 %vm520_vm2, %v3814_v21 }
0x1d07   : > { %v3955_v38 = vpop.f32.mrf.mxu1 }
0x1d08   : > { %v3956_v40 = vadd.f32 %v4494_v25, %v3955_v38 }
0x1d09   : > { %v5082_v26 = vpop.f32.mrf.mxu1 }
0x1d0a   : > { %v3960_v27 = vmul.f32 0.70710677, %v3956_v40  ;;  %v3959_v29 = vmul.f32 0.5, %v3956_v40 }
0x1d0c   : > { %5242 = verf.f32 %v3960_v27 }
0x1d19   : > { %v5243_v28 = vpop.eup %5242 }
0x1d1a   : > { %v3962_v30 = vadd.f32 1.0, %v5243_v28 }
0x1d1c   : > { %v3963_v31 = vmul.f32 %v3962_v30, %v3959_v29 }
0x1d1e   : > { %5092 = vmatmul.mubr.f32.vlgmr.msra.gmra.mxu0 %v3963_v31 }
0x1d1f   : > { %5126 = vmatprep.mubr.msk.f32.mxu0 %vm5309_vm3, %v5308_v16  ;;  %5095 = vmatpush3.xpose.msk.msra.mxu0 %vm520_vm2, %v4080_v44 }
0x1d20   : > { %5096 = vmatprep.subr.mxu0 %v5308_v16 }
0x1d23   : > { %5097 = vmatpush3.xpose.msk.msra.mxu0 %vm520_vm2, %v4079_v61 }
0x1d24   : > { %5098 = vmatprep.subr.mxu0 %v5308_v16 }
0x1d27   : > { %5099 = vmatpush3.xpose.msk.msra.mxu0 %vm520_vm2, %v4078_v15 }
0x1d28   : > { %5100 = vmatprep.subr.mxu0 %v5308_v16 }
0x1d2b   : > { %5101 = vmatpush3.xpose.msk.msra.mxu0 %vm520_vm2, %v4077_v45 }
0x1d2c   : > { %5102 = vmatprep.subr.mxu0 %v5308_v16 }
0x1d2f   : > { %5103 = vmatpush3.xpose.msk.msra.mxu0 %vm520_vm2, %v4076_v46 }
0x1d30   : > { %5104 = vmatprep.subr.mxu0 %v5308_v16 }
0x1d33   : > { %5105 = vmatpush3.xpose.msk.msra.mxu0 %vm520_vm2, %v4075_v47 }
0x1d34   : > { %5106 = vmatprep.subr.mxu0 %v5308_v16 }
0x1d37   : > { %5107 = vmatpush3.xpose.msk.msra.mxu0 %vm520_vm2, %v4074_v48 }
0x1d38   : > { %5108 = vmatprep.subr.mxu0 %v5308_v16 }
0x1d3b   : > { %5109 = vmatpush3.xpose.msk.msra.mxu0 %vm520_vm2, %v4073_v49 }
0x1d3c   : > { %5110 = vmatprep.subr.mxu0 %v5308_v16 }
0x1d3f   : > { %5111 = vmatpush3.xpose.msk.msra.mxu0 %vm520_vm2, %v4072_v50 }
0x1d40   : > { %5112 = vmatprep.subr.mxu0 %v5308_v16 }
0x1d43   : > { %5113 = vmatpush3.xpose.msk.msra.mxu0 %vm520_vm2, %v4071_v51 }
0x1d44   : > { %5114 = vmatprep.subr.mxu0 %v5308_v16 }
0x1d47   : > { %5115 = vmatpush3.xpose.msk.msra.mxu0 %vm520_vm2, %v4070_v4 }
0x1d48   : > { %5116 = vmatprep.subr.mxu0 %v5308_v16 }
0x1d4b   : > { %5117 = vmatpush3.xpose.msk.msra.mxu0 %vm520_vm2, %v4069_v58 }
0x1d4c   : > { %5118 = vmatprep.subr.mxu0 %v5308_v16 }
0x1d4f   : > { %5119 = vmatpush3.xpose.msk.msra.mxu0 %vm520_vm2, %v4068_v57 }
0x1d50   : > { %5120 = vmatprep.subr.mxu0 %v5308_v16 }
0x1d53   : > { %5121 = vmatpush3.xpose.msk.msra.mxu0 %vm520_vm2, %v4067_v59 }
0x1d54   : > { %5122 = vmatprep.subr.mxu0 %v5308_v16 }
0x1d57   : > { %5123 = vmatpush3.xpose.msk.msra.mxu0 %vm520_vm2, %v4066_v60 }
0x1d58   : > { %5124 = vmatprep.subr.mxu0 %v5308_v16 }
0x1d5b   : > { %5125 = vmatpush3.xpose.msk.msra.mxu0 %vm520_vm2, %v4065_v24 }
0x1dde   : > { %v4035_v33 = vpop.f32.mrf.mxu0 }
0x1ddf   : > { %v4039_v34 = vadd.f32 %v4035_v33, %v6276_v54 }
0x1de0   : > { %v5093_v35 = vpop.f32.mrf.mxu0 }
0x1de1   : > { %v4044_v42 = vadd.f32 %v4043_v32, %v4039_v34 }
0x1de3   : > { %v4047_v43 = vsel %vm4046_vm10, %v4044_v42, 0.0 }
0x1de4   : > { %4048 = vadd.xlane.f32.xlu0 %v4047_v43 }
0x1e6d   : > { %v4049_v52 = vpop.xlane.xlu0 %4048 }
0x1e6e   : > { %v4050_v53 = vmul.f32 0.03125, %v4049_v52 }
0x1e70   : > { %v4051_v54 = vsub.f32 %v4044_v42, %v4050_v53 }
0x1e72   : > { %v4052_v55 = vmul.f32 %v4051_v54, %v4051_v54 }
0x1e74   : > { %v4053_v56 = vsel %vm4046_vm10, %v4052_v55, 0.0 }
0x1e75   : > { %4054 = vadd.xlane.f32.xlu1 %v4053_v56 }
0x1efe   : > { %v4055_v62 = vpop.xlane.xlu1 %4054 }
0x1eff   : > { %v4056_v63 = vmul.f32 0.03125, %v4055_v62 }
0x1f01   : > { %v4057_v0 = vadd.f32 1e-05, %v4056_v63 }
0x1f03   : > { %5244 = vrsqrt.f32 %v4057_v0 }
0x1f10   : > { %v5245_v3 = vpop.eup %5244 }
0x1f11   : > { %v4059_v5 = vmul.f32 %v5245_v3, %v4051_v54 }
0x1f13   : > { %v4060_v39 = vmul.f32 %v4059_v5, %v4045_v1 }
0x1f15   : > { %v4064_v16 = vadd.f32 %v4062_v37, %v4060_v39 }
0x1f17   : > { %5127 = vmatmul.mubr.msk.f32.vlgmr.msra.gmra.mxu0 %vm520_vm2, %v4064_v16 }
0x1fd7   : > { %v4200_v6 = vpop.f32.mrf.mxu0 }
0x1fd8   : > { %v4201_v7 = vadd.f32 %v4200_v6, %v4081_v2 }
0x1fd9   : > { %v5128_v8 = vpop.f32.mrf.mxu0 }
0x1fda   : > { %4204 = vst [vmem:[%s378_s14] sm:$0x1] %v4201_v7 }
0x1fdb   : > { %5259 = shalt.err (!%p5256_p3)
}
0x1fdc   : > { %s5260_s12 = scalar_lea.hbm %s6480_s26, 16  ;;  %s5264_s30 = scalar_lea.hbm %s6526_s11, 32 }
0x1fdd   : > { %p5261_p4 = scmp.ne.s32.totalorder %s6480_s26, %s5260_s12  ;;  %p5265_p9 = scmp.lt.s32.totalorder %s6480_s26, %s6526_s11 }
0x1fde   : > { %p5266_p10 = scmp.lt.s32.totalorder %s5264_s30, %s5260_s12 }
0x1fdf   : > { %p5262_p7 = pnand %p5261_p4, %p5417_p5 }
0x1fe0   : > { %p5267_p11 = por %p5266_p10, %p5265_p9 }
0x1fe1   : > { %p5263_p8 = pneg %p5262_p7 }
0x1fe3   : > { %p5268_p12 = pnand %p5267_p11, %p5263_p8 }
0x1fe5   : > { %5271 = shalt.err (!%p5268_p12)
}
0x1fe6   : > { %5129 = dma.vmem_to_hbm [thread:$0]  (%p5417_p5), %s4219_s29, 16, %s6480_s26, %s4206_s16  }
0x1fe7 PF: > { %p5135_p13 = scmp.ge.s32.totalorder %s5306_s20, 2  ;;  %s4230_s25 = sand.u32 1, %s5294_s17  }
0x1fe8   : > { %s4231_s21 = scalar_lea.sflag [#allocation3], %s4230_s25 }
0x1fe9   : > { %p5132_p0 = pnand %p5135_p13, %p5421_p6 }
0x1feb   : > { %p5133_p1 = pneg %p5132_p0 }
0x1fed   : > { %5289 = dma.done.wait (%p5133_p1), %s4231_s21, 16  }
0x1fee   : > { %5291 = vsyncadd (%p5133_p1), %s4231_s21, 4294967280  ;;  %s6551_s24 = sld [smem:[#allocation5_spill]]  ;;  %p21_p2 = scmp.ge.s32.totalorder %s5404_s23, 4  }
0x1fef   : > { %s6552_s17 = smov %s5298_s18  ;;  %s6553_s18 = smov %s5302_s19 }
0x1ff0   : > { %s6555_s20 = smov %s5404_s23  ;;  %23 = sbr.rel (!%p21_p2) target bundleno = 3 (0x3), region = 111 }
0x1ff4   : > { %s6554_s19 = smov %s6551_s24 }
0x1ff5   :  { %4235 = vsyncpa [#allocation3], 1 }
0x1ff6   :  { %4237 = vsyncpa [#allocation3 + $0x1], 1 }

</bundles_post_ra>
